<compile_context>
chip_gen: v6e
topology: v6e:2x2x1
jax: 0.10.0
libtpu: 0.0.40
codegen_flags: <defaults>
</compile_context>

<pallas_src>
import functools

import jax
import jax.numpy as jnp
from jax.experimental import pallas as pl
from jax.experimental.pallas import tpu as pltpu

EPS = 1e-5
MXU_DTYPE = jnp.bfloat16            # matmul operand dtype (f32 accumulation)
VMEM_LIMIT = 32 * 1024 * 1024       # safe on v5e/v6e (128 MiB) and v7x (64 MiB)


# --------------------------------------------------------------------------
# Pallas kernel 1: direct convolution (3x3 / 1x1, stride 1 or 2, no bias)
# --------------------------------------------------------------------------
def _conv_kernel(S, KH, KW, TH, Wo, x_ref, w_ref, o_ref):
    """One (batch, output-row-tile) block of a direct convolution.

    x_ref: [S*S, Hq, Wq, Cin]  phase-decomposed padded input (f32, resident
                               across the row-tile axis for this batch image)
    w_ref: [KH*KW, Cin, Cout]  per-tap weight slabs (bf16)
    o_ref: [TH*Wo, Cout]       output rows for this tile (f32)
    """
    cin = x_ref.shape[-1]
    h0 = pl.multiple_of(pl.program_id(1) * TH, TH)
    acc = jnp.zeros((TH * Wo, o_ref.shape[-1]), jnp.float32)
    for kh in range(KH):
        for kw in range(KW):
            ph = (kh % S) * S + (kw % S)          # which stride-phase tensor
            a = x_ref[ph, pl.ds(h0 + kh // S, TH), pl.ds(kw // S, Wo), :]
            a = a.reshape(TH * Wo, cin).astype(w_ref.dtype)
            acc = acc + jnp.dot(a, w_ref[kh * KW + kw],
                                preferred_element_type=jnp.float32)
    o_ref[...] = acc


def conv2d_nhwc(x, w, stride=1):
    """x: [N,H,W,Cin] f32 NHWC; w: PyTorch layout [Cout,Cin,KH,KW]; no bias.

    Returns (out2d [N*Ho*Wo, Cout] f32, Ho, Wo)."""
    N, H, W, Cin = x.shape
    Cout, Cin2, KH, KW = w.shape
    assert Cin == Cin2
    pad = (KH - 1) // 2                     # 3x3 -> 1, 1x1 -> 0 (matches module)
    Ho = (H + 2 * pad - KH) // stride + 1
    Wo = (W + 2 * pad - KW) // stride + 1

    if KH == 1 and KW == 1:
        # 1x1 conv: subsample once (1x traffic), then it is a plain matmul.
        S = 1
        phases = x[:, ::stride, ::stride, :]
        Hq, Wq = phases.shape[1], phases.shape[2]
    else:
        S = stride
        Hp, Wp = H + 2 * pad, W + 2 * pad
        Hp2 = -(-Hp // S) * S               # round padded extent up to stride
        Wp2 = -(-Wp // S) * S
        xp = jnp.pad(x, ((0, 0), (pad, pad + Hp2 - Hp),
                         (pad, pad + Wp2 - Wp), (0, 0)))
        Hq, Wq = Hp2 // S, Wp2 // S
        if S == 1:
            phases = xp
        else:
            # space-to-phase (1x traffic): strided conv -> stride-1 taps.
            phases = xp.reshape(N, Hq, S, Wq, S, Cin)
            phases = phases.transpose(0, 2, 4, 1, 3, 5)
    phases = phases.reshape(N * S * S, Hq, Wq, Cin)          # activations: f32

    # [Cout,Cin,KH,KW] -> [KH*KW, Cin, Cout], bf16 for the MXU.
    w_t = jnp.transpose(w, (2, 3, 1, 0)).reshape(KH * KW, Cin, Cout)
    w_t = w_t.astype(MXU_DTYPE)

    # Row tiling: largest divisor of Ho whose output block keeps the sublane
    # dim a multiple of 8 and stays within a modest per-step VMEM budget.
    TH = Ho
    for cand in range(Ho, 0, -1):
        if (Ho % cand == 0 and (cand * Wo) % 8 == 0
                and cand * Wo * Cout * 4 <= (2 << 20)):
            TH = cand
            break
    nH = Ho // TH
    M = N * Ho * Wo

    kernel = functools.partial(_conv_kernel, S, KH, KW, TH, Wo)
    out = pl.pallas_call(
        kernel,
        out_shape=jax.ShapeDtypeStruct((M, Cout), jnp.float32),
        grid_spec=pltpu.PrefetchScalarGridSpec(
            num_scalar_prefetch=0,
            grid=(N, nH),
            in_specs=[
                # whole phase-decomposed image of batch n, resident across h
                pl.BlockSpec((S * S, Hq, Wq, Cin), lambda n, h: (n, 0, 0, 0)),
                pl.BlockSpec((KH * KW, Cin, Cout), lambda n, h: (0, 0, 0)),
            ],
            out_specs=pl.BlockSpec((TH * Wo, Cout),
                                   lambda n, h: (n * nH + h, 0)),
        ),
        compiler_params=pltpu.CompilerParams(
            dimension_semantics=("parallel", "parallel"),
            vmem_limit_bytes=VMEM_LIMIT),
    )(phases, w_t)
    return out, Ho, Wo


# --------------------------------------------------------------------------
# Pallas kernels 2+3: two-pass training-mode BatchNorm (+ residual + ReLU)
# --------------------------------------------------------------------------
def _bn_stats_kernel(x_ref, s_ref):
    """Accumulate per-channel sum (row 0) and sum-of-squares (row 1)."""
    @pl.when(pl.program_id(0) == 0)
    def _():
        s_ref[...] = jnp.zeros_like(s_ref)

    x = x_ref[...]
    part = jnp.concatenate([jnp.sum(x, axis=0, keepdims=True),
                            jnp.sum(x * x, axis=0, keepdims=True)], axis=0)
    s_ref[...] += part


def _bn_apply_kernel(relu, has_res, *refs):
    if has_res:
        x_ref, res_ref, scale_ref, shift_ref, o_ref = refs
    else:
        x_ref, scale_ref, shift_ref, o_ref = refs
    y = x_ref[...] * scale_ref[...] + shift_ref[...]
    if has_res:
        y = y + res_ref[...]
    if relu:
        y = jnp.maximum(y, 0.0)
    o_ref[...] = y


def batchnorm_act(x2d, gamma, beta, residual=None, relu=True):
    """Training-mode BatchNorm over a [M, C] slab (per-channel batch stats,
    biased variance, eps=1e-5), fused with optional residual add and ReLU."""
    M, C = x2d.shape

    # Fold narrow channel counts into full 128-wide lanes for dense stores.
    F = 1
    if C < 128 and 128 % C == 0 and M % (128 // C) == 0:
        F = 128 // C
    Mf, Cf = M // F, C * F
    xf = x2d.reshape(Mf, Cf)
    resf = residual.reshape(Mf, Cf) if residual is not None else None

    # Row tile: largest divisor of Mf, multiple of 8 (or the full extent),
    # within a ~2 MiB per-operand budget per grid step.
    TM = Mf
    for cand in range(min(Mf, 2048), 0, -1):
        if (Mf % cand == 0 and (cand % 8 == 0 or cand == Mf)
                and cand * Cf * 4 <= (2 << 20)):
            TM = cand
            break
    n_tiles = Mf // TM

    # ---- pass 1: per-(folded-lane) sum and sum-of-squares ------------------
    stats = pl.pallas_call(
        _bn_stats_kernel,
        out_shape=jax.ShapeDtypeStruct((2, Cf), jnp.float32),
        grid_spec=pltpu.PrefetchScalarGridSpec(
            num_scalar_prefetch=0,
            grid=(n_tiles,),
            in_specs=[pl.BlockSpec((TM, Cf), lambda i: (i, 0))],
            out_specs=pl.BlockSpec((2, Cf), lambda i: (0, 0)),
        ),
        compiler_params=pltpu.CompilerParams(
            dimension_semantics=("arbitrary",),
            vmem_limit_bytes=VMEM_LIMIT),
    )(xf)

    # O(C) scalar math (mean/var -> affine scale/shift) stays in XLA.
    s = stats[0].reshape(F, C).sum(axis=0)
    ss = stats[1].reshape(F, C).sum(axis=0)
    mean = s / M
    var = jnp.maximum(ss / M - mean * mean, 0.0)      # biased batch variance
    inv = jax.lax.rsqrt(var + EPS)
    scale = gamma * inv
    shift = beta - mean * scale
    scale_f = jnp.tile(scale, F).reshape(1, Cf).astype(jnp.float32)
    shift_f = jnp.tile(shift, F).reshape(1, Cf).astype(jnp.float32)

    # ---- pass 2: normalize (+ residual) (+ ReLU), tiled & parallel ----------
    inputs = [xf]
    specs = [pl.BlockSpec((TM, Cf), lambda i: (i, 0))]
    if resf is not None:
        inputs.append(resf)
        specs.append(pl.BlockSpec((TM, Cf), lambda i: (i, 0)))
    inputs += [scale_f, shift_f]
    specs += [pl.BlockSpec((1, Cf), lambda i: (0, 0)),
              pl.BlockSpec((1, Cf), lambda i: (0, 0))]

    kernel = functools.partial(_bn_apply_kernel, relu, residual is not None)
    out = pl.pallas_call(
        kernel,
        out_shape=jax.ShapeDtypeStruct((Mf, Cf), jnp.float32),
        grid_spec=pltpu.PrefetchScalarGridSpec(
            num_scalar_prefetch=0,
            grid=(n_tiles,),
            in_specs=specs,
            out_specs=pl.BlockSpec((TM, Cf), lambda i: (i, 0)),
        ),
        compiler_params=pltpu.CompilerParams(
            dimension_semantics=("parallel",),
            vmem_limit_bytes=VMEM_LIMIT),
    )(*inputs)
    return out.reshape(M, C)


# --------------------------------------------------------------------------
# BasicBlock: parameters + forward
# --------------------------------------------------------------------------
def init_basic_block(key, in_chn, dim_size, stride=1):
    ks = jax.random.split(key, 8)

    def conv_w(k, cout, cin, ksz):
        fan_in = cin * ksz * ksz
        return jax.random.normal(k, (cout, cin, ksz, ksz),
                                 jnp.float32) * (2.0 / fan_in) ** 0.5

    p = {
        "stride": stride,
        "downsample": stride == 2,
        "conv1_w": conv_w(ks[0], dim_size, in_chn, 3),
        "bn1_g": 1.0 + 0.1 * jax.random.normal(ks[1], (dim_size,), jnp.float32),
        "bn1_b": 0.1 * jax.random.normal(ks[2], (dim_size,), jnp.float32),
        "conv2_w": conv_w(ks[3], dim_size, dim_size, 3),
        "bn2_g": 1.0 + 0.1 * jax.random.normal(ks[4], (dim_size,), jnp.float32),
        "bn2_b": 0.1 * jax.random.normal(ks[5], (dim_size,), jnp.float32),
    }
    if stride == 2:
        p["ds_w"] = conv_w(ks[6], dim_size, in_chn, 1)
        p["ds_bn_g"] = jnp.ones((dim_size,), jnp.float32)
        p["ds_bn_b"] = jnp.zeros((dim_size,), jnp.float32)
    return p


def basic_block_forward(p, x_nchw):
    """Pallas implementation of BasicBlock.forward (NCHW in / NCHW out)."""
    stride = p["stride"]
    x = jnp.transpose(x_nchw, (0, 2, 3, 1))                     # NCHW -> NHWC
    N, H, W, Cin = x.shape

    out, Ho, Wo = conv2d_nhwc(x, p["conv1_w"], stride=stride)   # conv1
    out = batchnorm_act(out, p["bn1_g"], p["bn1_b"], relu=True)  # bn1 + relu
    out4 = out.reshape(N, Ho, Wo, -1)

    out2, _, _ = conv2d_nhwc(out4, p["conv2_w"], stride=1)      # conv2

    if p["downsample"]:
        ident, _, _ = conv2d_nhwc(x, p["ds_w"], stride=stride)  # 1x1, stride 2
        ident = batchnorm_act(ident, p["ds_bn_g"], p["ds_bn_b"], relu=False)
    else:
        ident = x.reshape(N * H * W, Cin)

    # bn2 -> += identity -> ReLU, all fused in the BN apply kernel.
    out2 = batchnorm_act(out2, p["bn2_g"], p["bn2_b"],
                         residual=ident, relu=True)
    out4 = out2.reshape(N, Ho, Wo, -1)
    return jnp.transpose(out4, (0, 3, 1, 2))                    # NHWC -> NCHW


if __name__ == "__main__":
    root = jax.random.PRNGKey(0)
    kx, k1, k2 = jax.random.split(root, 3)

    # Small deterministic input: NCHW [2, 32, 16, 16].
    x = jax.random.normal(kx, (2, 32, 16, 16), jnp.float32)

    # Exercise both module paths: stride-2 (with 1x1 downsample) + stride-1.
    block_a = init_basic_block(k1, in_chn=32, dim_size=64, stride=2)
    block_b = init_basic_block(k2, in_chn=64, dim_size=64, stride=1)

    @jax.jit
    def fwd(inp):
        y = basic_block_forward(block_a, inp)
        y = basic_block_forward(block_b, y)
        return y

    out = jax.block_until_ready(fwd(x))
    assert out.shape == (2, 64, 8, 8), out.shape
    assert bool(jnp.all(jnp.isfinite(out)))
    print("KERNEL_OK")
</pallas_src>

<mosaic_0001>
module attributes {stable_mosaic.version = 11 : i64} {
  func.func @_conv_kernel(%arg0: i32, %arg1: i32, %arg2: memref<4x9x9x32xf32, #tpu.memory_space<vmem>>, %arg3: memref<9x32x64xbf16, #tpu.memory_space<vmem>>, %arg4: memref<64x64xf32, #tpu.memory_space<vmem>>) attributes {dimension_semantics = [#tpu.dimension_semantics<parallel>, #tpu.dimension_semantics<parallel>], iteration_bounds = array<i64: 2, 1>, scalar_prefetch = 0 : i64, scratch_operands = 0 : i64, tpu.core_type = #tpu.core_type<tc>, window_params = [{transform_indices = @transform_0, window_bounds = array<i64: 4, 9, 9, 32>}, {pipeline_mode = #tpu.pipeline_mode<synchronous>, transform_indices = @transform_1, window_bounds = array<i64: 9, 32, 64>}, {transform_indices = @transform_2, window_bounds = array<i64: 64, 64>}]} {
    %c8_i32 = arith.constant 8 : i32
    %0 = arith.muli %arg1, %c8_i32 : i32
    %1 = tpu.assume_multiple %0, 8 : i32
    %cst = arith.constant 0.000000e+00 : f32
    %2 = vector.broadcast %cst : f32 to vector<64x64xf32>
    %c0_i32 = arith.constant 0 : i32
    %3 = arith.addi %1, %c0_i32 : i32
    %c0 = arith.constant 0 : index
    %4 = arith.index_cast %3 : i32 to index
    %c0_0 = arith.constant 0 : index
    %c0_1 = arith.constant 0 : index
    %5 = vector.load %arg2[%c0, %4, %c0_0, %c0_1] : memref<4x9x9x32xf32, #tpu.memory_space<vmem>>, vector<1x8x8x32xf32>
    %6 = vector.shape_cast %5 : vector<1x8x8x32xf32> to vector<8x8x32xf32>
    %7 = vector.shape_cast %6 : vector<8x8x32xf32> to vector<64x32xf32>
    %8 = arith.truncf %7 : vector<64x32xf32> to vector<64x32xbf16>
    %c0_2 = arith.constant 0 : index
    %c0_3 = arith.constant 0 : index
    %c0_4 = arith.constant 0 : index
    %9 = vector.load %arg3[%c0_2, %c0_3, %c0_4] : memref<9x32x64xbf16, #tpu.memory_space<vmem>>, vector<1x32x64xbf16>
    %10 = vector.shape_cast %9 : vector<1x32x64xbf16> to vector<32x64xbf16>
    %cst_5 = arith.constant dense<0.000000e+00> : vector<64x64xf32>
    %11 = tpu.matmul %8, %10, %cst_5 {dimension_numbers = #tpu.dot_dimension_numbers<[1], [0], [0], [1], [0, 0, 1, 1], [], []>} : vector<64x32xbf16>, vector<32x64xbf16>, vector<64x64xf32> -> vector<64x64xf32>
    %12 = arith.addf %2, %11 : vector<64x64xf32>
    %c0_i32_6 = arith.constant 0 : i32
    %13 = arith.addi %1, %c0_i32_6 : i32
    %c1 = arith.constant 1 : index
    %14 = arith.index_cast %13 : i32 to index
    %c0_7 = arith.constant 0 : index
    %c0_8 = arith.constant 0 : index
    %15 = vector.load %arg2[%c1, %14, %c0_7, %c0_8] : memref<4x9x9x32xf32, #tpu.memory_space<vmem>>, vector<1x8x8x32xf32>
    %16 = vector.shape_cast %15 : vector<1x8x8x32xf32> to vector<8x8x32xf32>
    %17 = vector.shape_cast %16 : vector<8x8x32xf32> to vector<64x32xf32>
    %18 = arith.truncf %17 : vector<64x32xf32> to vector<64x32xbf16>
    %c1_9 = arith.constant 1 : index
    %c0_10 = arith.constant 0 : index
    %c0_11 = arith.constant 0 : index
    %19 = vector.load %arg3[%c1_9, %c0_10, %c0_11] : memref<9x32x64xbf16, #tpu.memory_space<vmem>>, vector<1x32x64xbf16>
    %20 = vector.shape_cast %19 : vector<1x32x64xbf16> to vector<32x64xbf16>
    %cst_12 = arith.constant dense<0.000000e+00> : vector<64x64xf32>
    %21 = tpu.matmul %18, %20, %cst_12 {dimension_numbers = #tpu.dot_dimension_numbers<[1], [0], [0], [1], [0, 0, 1, 1], [], []>} : vector<64x32xbf16>, vector<32x64xbf16>, vector<64x64xf32> -> vector<64x64xf32>
    %22 = arith.addf %12, %21 : vector<64x64xf32>
    %c0_i32_13 = arith.constant 0 : i32
    %23 = arith.addi %1, %c0_i32_13 : i32
    %c0_14 = arith.constant 0 : index
    %24 = arith.index_cast %23 : i32 to index
    %c1_15 = arith.constant 1 : index
    %c0_16 = arith.constant 0 : index
    %25 = vector.load %arg2[%c0_14, %24, %c1_15, %c0_16] : memref<4x9x9x32xf32, #tpu.memory_space<vmem>>, vector<1x8x8x32xf32>
    %26 = vector.shape_cast %25 : vector<1x8x8x32xf32> to vector<8x8x32xf32>
    %27 = vector.shape_cast %26 : vector<8x8x32xf32> to vector<64x32xf32>
    %28 = arith.truncf %27 : vector<64x32xf32> to vector<64x32xbf16>
    %c2 = arith.constant 2 : index
    %c0_17 = arith.constant 0 : index
    %c0_18 = arith.constant 0 : index
    %29 = vector.load %arg3[%c2, %c0_17, %c0_18] : memref<9x32x64xbf16, #tpu.memory_space<vmem>>, vector<1x32x64xbf16>
    %30 = vector.shape_cast %29 : vector<1x32x64xbf16> to vector<32x64xbf16>
    %cst_19 = arith.constant dense<0.000000e+00> : vector<64x64xf32>
    %31 = tpu.matmul %28, %30, %cst_19 {dimension_numbers = #tpu.dot_dimension_numbers<[1], [0], [0], [1], [0, 0, 1, 1], [], []>} : vector<64x32xbf16>, vector<32x64xbf16>, vector<64x64xf32> -> vector<64x64xf32>
    %32 = arith.addf %22, %31 : vector<64x64xf32>
    %c0_i32_20 = arith.constant 0 : i32
    %33 = arith.addi %1, %c0_i32_20 : i32
    %c2_21 = arith.constant 2 : index
    %34 = arith.index_cast %33 : i32 to index
    %c0_22 = arith.constant 0 : index
    %c0_23 = arith.constant 0 : index
    %35 = vector.load %arg2[%c2_21, %34, %c0_22, %c0_23] : memref<4x9x9x32xf32, #tpu.memory_space<vmem>>, vector<1x8x8x32xf32>
    %36 = vector.shape_cast %35 : vector<1x8x8x32xf32> to vector<8x8x32xf32>
    %37 = vector.shape_cast %36 : vector<8x8x32xf32> to vector<64x32xf32>
    %38 = arith.truncf %37 : vector<64x32xf32> to vector<64x32xbf16>
    %c3 = arith.constant 3 : index
    %c0_24 = arith.constant 0 : index
    %c0_25 = arith.constant 0 : index
    %39 = vector.load %arg3[%c3, %c0_24, %c0_25] : memref<9x32x64xbf16, #tpu.memory_space<vmem>>, vector<1x32x64xbf16>
    %40 = vector.shape_cast %39 : vector<1x32x64xbf16> to vector<32x64xbf16>
    %cst_26 = arith.constant dense<0.000000e+00> : vector<64x64xf32>
    %41 = tpu.matmul %38, %40, %cst_26 {dimension_numbers = #tpu.dot_dimension_numbers<[1], [0], [0], [1], [0, 0, 1, 1], [], []>} : vector<64x32xbf16>, vector<32x64xbf16>, vector<64x64xf32> -> vector<64x64xf32>
    %42 = arith.addf %32, %41 : vector<64x64xf32>
    %c0_i32_27 = arith.constant 0 : i32
    %43 = arith.addi %1, %c0_i32_27 : i32
    %c3_28 = arith.constant 3 : index
    %44 = arith.index_cast %43 : i32 to index
    %c0_29 = arith.constant 0 : index
    %c0_30 = arith.constant 0 : index
    %45 = vector.load %arg2[%c3_28, %44, %c0_29, %c0_30] : memref<4x9x9x32xf32, #tpu.memory_space<vmem>>, vector<1x8x8x32xf32>
    %46 = vector.shape_cast %45 : vector<1x8x8x32xf32> to vector<8x8x32xf32>
    %47 = vector.shape_cast %46 : vector<8x8x32xf32> to vector<64x32xf32>
    %48 = arith.truncf %47 : vector<64x32xf32> to vector<64x32xbf16>
    %c4 = arith.constant 4 : index
    %c0_31 = arith.constant 0 : index
    %c0_32 = arith.constant 0 : index
    %49 = vector.load %arg3[%c4, %c0_31, %c0_32] : memref<9x32x64xbf16, #tpu.memory_space<vmem>>, vector<1x32x64xbf16>
    %50 = vector.shape_cast %49 : vector<1x32x64xbf16> to vector<32x64xbf16>
    %cst_33 = arith.constant dense<0.000000e+00> : vector<64x64xf32>
    %51 = tpu.matmul %48, %50, %cst_33 {dimension_numbers = #tpu.dot_dimension_numbers<[1], [0], [0], [1], [0, 0, 1, 1], [], []>} : vector<64x32xbf16>, vector<32x64xbf16>, vector<64x64xf32> -> vector<64x64xf32>
    %52 = arith.addf %42, %51 : vector<64x64xf32>
    %c0_i32_34 = arith.constant 0 : i32
    %53 = arith.addi %1, %c0_i32_34 : i32
    %c2_35 = arith.constant 2 : index
    %54 = arith.index_cast %53 : i32 to index
    %c1_36 = arith.constant 1 : index
    %c0_37 = arith.constant 0 : index
    %55 = vector.load %arg2[%c2_35, %54, %c1_36, %c0_37] : memref<4x9x9x32xf32, #tpu.memory_space<vmem>>, vector<1x8x8x32xf32>
    %56 = vector.shape_cast %55 : vector<1x8x8x32xf32> to vector<8x8x32xf32>
    %57 = vector.shape_cast %56 : vector<8x8x32xf32> to vector<64x32xf32>
    %58 = arith.truncf %57 : vector<64x32xf32> to vector<64x32xbf16>
    %c5 = arith.constant 5 : index
    %c0_38 = arith.constant 0 : index
    %c0_39 = arith.constant 0 : index
    %59 = vector.load %arg3[%c5, %c0_38, %c0_39] : memref<9x32x64xbf16, #tpu.memory_space<vmem>>, vector<1x32x64xbf16>
    %60 = vector.shape_cast %59 : vector<1x32x64xbf16> to vector<32x64xbf16>
    %cst_40 = arith.constant dense<0.000000e+00> : vector<64x64xf32>
    %61 = tpu.matmul %58, %60, %cst_40 {dimension_numbers = #tpu.dot_dimension_numbers<[1], [0], [0], [1], [0, 0, 1, 1], [], []>} : vector<64x32xbf16>, vector<32x64xbf16>, vector<64x64xf32> -> vector<64x64xf32>
    %62 = arith.addf %52, %61 : vector<64x64xf32>
    %c1_i32 = arith.constant 1 : i32
    %63 = arith.addi %1, %c1_i32 : i32
    %c0_41 = arith.constant 0 : index
    %64 = arith.index_cast %63 : i32 to index
    %c0_42 = arith.constant 0 : index
    %c0_43 = arith.constant 0 : index
    %65 = vector.load %arg2[%c0_41, %64, %c0_42, %c0_43] : memref<4x9x9x32xf32, #tpu.memory_space<vmem>>, vector<1x8x8x32xf32>
    %66 = vector.shape_cast %65 : vector<1x8x8x32xf32> to vector<8x8x32xf32>
    %67 = vector.shape_cast %66 : vector<8x8x32xf32> to vector<64x32xf32>
    %68 = arith.truncf %67 : vector<64x32xf32> to vector<64x32xbf16>
    %c6 = arith.constant 6 : index
    %c0_44 = arith.constant 0 : index
    %c0_45 = arith.constant 0 : index
    %69 = vector.load %arg3[%c6, %c0_44, %c0_45] : memref<9x32x64xbf16, #tpu.memory_space<vmem>>, vector<1x32x64xbf16>
    %70 = vector.shape_cast %69 : vector<1x32x64xbf16> to vector<32x64xbf16>
    %cst_46 = arith.constant dense<0.000000e+00> : vector<64x64xf32>
    %71 = tpu.matmul %68, %70, %cst_46 {dimension_numbers = #tpu.dot_dimension_numbers<[1], [0], [0], [1], [0, 0, 1, 1], [], []>} : vector<64x32xbf16>, vector<32x64xbf16>, vector<64x64xf32> -> vector<64x64xf32>
    %72 = arith.addf %62, %71 : vector<64x64xf32>
    %c1_i32_47 = arith.constant 1 : i32
    %73 = arith.addi %1, %c1_i32_47 : i32
    %c1_48 = arith.constant 1 : index
    %74 = arith.index_cast %73 : i32 to index
    %c0_49 = arith.constant 0 : index
    %c0_50 = arith.constant 0 : index
    %75 = vector.load %arg2[%c1_48, %74, %c0_49, %c0_50] : memref<4x9x9x32xf32, #tpu.memory_space<vmem>>, vector<1x8x8x32xf32>
    %76 = vector.shape_cast %75 : vector<1x8x8x32xf32> to vector<8x8x32xf32>
    %77 = vector.shape_cast %76 : vector<8x8x32xf32> to vector<64x32xf32>
    %78 = arith.truncf %77 : vector<64x32xf32> to vector<64x32xbf16>
    %c7 = arith.constant 7 : index
    %c0_51 = arith.constant 0 : index
    %c0_52 = arith.constant 0 : index
    %79 = vector.load %arg3[%c7, %c0_51, %c0_52] : memref<9x32x64xbf16, #tpu.memory_space<vmem>>, vector<1x32x64xbf16>
    %80 = vector.shape_cast %79 : vector<1x32x64xbf16> to vector<32x64xbf16>
    %cst_53 = arith.constant dense<0.000000e+00> : vector<64x64xf32>
    %81 = tpu.matmul %78, %80, %cst_53 {dimension_numbers = #tpu.dot_dimension_numbers<[1], [0], [0], [1], [0, 0, 1, 1], [], []>} : vector<64x32xbf16>, vector<32x64xbf16>, vector<64x64xf32> -> vector<64x64xf32>
    %82 = arith.addf %72, %81 : vector<64x64xf32>
    %c1_i32_54 = arith.constant 1 : i32
    %83 = arith.addi %1, %c1_i32_54 : i32
    %c0_55 = arith.constant 0 : index
    %84 = arith.index_cast %83 : i32 to index
    %c1_56 = arith.constant 1 : index
    %c0_57 = arith.constant 0 : index
    %85 = vector.load %arg2[%c0_55, %84, %c1_56, %c0_57] : memref<4x9x9x32xf32, #tpu.memory_space<vmem>>, vector<1x8x8x32xf32>
    %86 = vector.shape_cast %85 : vector<1x8x8x32xf32> to vector<8x8x32xf32>
    %87 = vector.shape_cast %86 : vector<8x8x32xf32> to vector<64x32xf32>
    %88 = arith.truncf %87 : vector<64x32xf32> to vector<64x32xbf16>
    %c8 = arith.constant 8 : index
    %c0_58 = arith.constant 0 : index
    %c0_59 = arith.constant 0 : index
    %89 = vector.load %arg3[%c8, %c0_58, %c0_59] : memref<9x32x64xbf16, #tpu.memory_space<vmem>>, vector<1x32x64xbf16>
    %90 = vector.shape_cast %89 : vector<1x32x64xbf16> to vector<32x64xbf16>
    %cst_60 = arith.constant dense<0.000000e+00> : vector<64x64xf32>
    %91 = tpu.matmul %88, %90, %cst_60 {dimension_numbers = #tpu.dot_dimension_numbers<[1], [0], [0], [1], [0, 0, 1, 1], [], []>} : vector<64x32xbf16>, vector<32x64xbf16>, vector<64x64xf32> -> vector<64x64xf32>
    %92 = arith.addf %82, %91 : vector<64x64xf32>
    %c0_61 = arith.constant 0 : index
    %c0_62 = arith.constant 0 : index
    %93 = vector.load %arg4[%c0_61, %c0_62] : memref<64x64xf32, #tpu.memory_space<vmem>>, vector<64x64xf32>
    tpu.vector_store %arg4[%c0_61, %c0_62], %92 {strides = array<i32>} : memref<64x64xf32, #tpu.memory_space<vmem>>, vector<64x64xf32>,
    return
  }
  func.func @transform_0(%arg0: i32, %arg1: i32) -> (i32, i32, i32, i32) {
    %c0_i32 = arith.constant 0 : i32
    %c0_i32_0 = arith.constant 0 : i32
    %c0_i32_1 = arith.constant 0 : i32
    %c0_i32_2 = arith.constant 0 : i32
    return %arg0, %c0_i32, %c0_i32_0, %c0_i32_1 : i32, i32, i32, i32
  }
  func.func @transform_1(%arg0: i32, %arg1: i32) -> (i32, i32, i32) {
    %c0_i32 = arith.constant 0 : i32
    %c0_i32_0 = arith.constant 0 : i32
    %c0_i32_1 = arith.constant 0 : i32
    %c0_i32_2 = arith.constant 0 : i32
    return %c0_i32, %c0_i32_0, %c0_i32_1 : i32, i32, i32
  }
  func.func @transform_2(%arg0: i32, %arg1: i32) -> (i32, i32) {
    %c1_i32 = arith.constant 1 : i32
    %0 = arith.muli %arg0, %c1_i32 : i32
    %1 = arith.addi %0, %arg1 : i32
    %c0_i32 = arith.constant 0 : i32
    %c0_i32_0 = arith.constant 0 : i32
    return %1, %c0_i32 : i32, i32
  }
}

module attributes {stable_mosaic.version = 11 : i64} {
  func.func @_bn_stats_kernel(%arg0: i32, %arg1: memref<64x128xf32, #tpu.memory_space<vmem>>, %arg2: memref<2x128xf32, #tpu.memory_space<vmem>>) attributes {dimension_semantics = [#tpu.dimension_semantics<arbitrary>], iteration_bounds = array<i64: 1>, scalar_prefetch = 0 : i64, scratch_operands = 0 : i64, tpu.core_type = #tpu.core_type<tc>, window_params = [{transform_indices = @transform_0, window_bounds = array<i64: 64, 128>}, {pipeline_mode = #tpu.pipeline_mode<synchronous>, transform_indices = @transform_1, window_bounds = array<i64: 2, 128>}]} {
    %c0_i32 = arith.constant 0 : i32
    %0 = arith.cmpi eq, %arg0, %c0_i32 : i32
    %1 = arith.extui %0 : i1 to i32
    %c0_i32_0 = arith.constant 0 : i32
    %2 = arith.cmpi ne, %1, %c0_i32_0 : i32
    scf.if %2 {
      %cst_7 = arith.constant 0.000000e+00 : f32
      %13 = vector.broadcast %cst_7 : f32 to vector<2x128xf32>
      %c0_8 = arith.constant 0 : index
      %c0_9 = arith.constant 0 : index
      %14 = vector.load %arg2[%c0_8, %c0_9] : memref<2x128xf32, #tpu.memory_space<vmem>>, vector<2x128xf32>
      tpu.vector_store %arg2[%c0_8, %c0_9], %13 {strides = array<i32>} : memref<2x128xf32, #tpu.memory_space<vmem>>, vector<2x128xf32>,
    } else {
    }
    %c0 = arith.constant 0 : index
    %c0_1 = arith.constant 0 : index
    %3 = vector.load %arg1[%c0, %c0_1] : memref<64x128xf32, #tpu.memory_space<vmem>>, vector<64x128xf32>
    %cst = arith.constant dense<0.000000e+00> : vector<128xf32>
    %4 = vector.multi_reduction <add>, %3, %cst [0] : vector<64x128xf32> to vector<128xf32>
    %5 = vector.shape_cast %4 : vector<128xf32> to vector<1x128xf32>
    %6 = arith.mulf %3, %3 : vector<64x128xf32>
    %cst_2 = arith.constant dense<0.000000e+00> : vector<128xf32>
    %7 = vector.multi_reduction <add>, %6, %cst_2 [0] : vector<64x128xf32> to vector<128xf32>
    %8 = vector.shape_cast %7 : vector<128xf32> to vector<1x128xf32>
    %9 = tpu.concatenate %5, %8 in 0 : vector<1x128xf32>, vector<1x128xf32> -> vector<2x128xf32>
    %c0_3 = arith.constant 0 : index
    %c0_4 = arith.constant 0 : index
    %10 = vector.load %arg2[%c0_3, %c0_4] : memref<2x128xf32, #tpu.memory_space<vmem>>, vector<2x128xf32>
    %11 = arith.addf %10, %9 : vector<2x128xf32>
    %c0_5 = arith.constant 0 : index
    %c0_6 = arith.constant 0 : index
    %12 = vector.load %arg2[%c0_5, %c0_6] : memref<2x128xf32, #tpu.memory_space<vmem>>, vector<2x128xf32>
    tpu.vector_store %arg2[%c0_5, %c0_6], %11 {strides = array<i32>} : memref<2x128xf32, #tpu.memory_space<vmem>>, vector<2x128xf32>,
    return
  }
  func.func @transform_0(%arg0: i32) -> (i32, i32) {
    %c0_i32 = arith.constant 0 : i32
    %c0_i32_0 = arith.constant 0 : i32
    return %arg0, %c0_i32 : i32, i32
  }
  func.func @transform_1(%arg0: i32) -> (i32, i32) {
    %c0_i32 = arith.constant 0 : i32
    %c0_i32_0 = arith.constant 0 : i32
    %c0_i32_1 = arith.constant 0 : i32
    return %c0_i32, %c0_i32_0 : i32, i32
  }
}

module attributes {stable_mosaic.version = 11 : i64} {
  func.func @_bn_apply_kernel(%arg0: i32, %arg1: memref<64x128xf32, #tpu.memory_space<vmem>>, %arg2: memref<1x128xf32, #tpu.memory_space<vmem>>, %arg3: memref<1x128xf32, #tpu.memory_space<vmem>>, %arg4: memref<64x128xf32, #tpu.memory_space<vmem>>) attributes {dimension_semantics = [#tpu.dimension_semantics<parallel>], iteration_bounds = array<i64: 1>, scalar_prefetch = 0 : i64, scratch_operands = 0 : i64, tpu.core_type = #tpu.core_type<tc>, window_params = [{transform_indices = @transform_0, window_bounds = array<i64: 64, 128>}, {pipeline_mode = #tpu.pipeline_mode<synchronous>, transform_indices = @transform_1, window_bounds = array<i64: 1, 128>}, {pipeline_mode = #tpu.pipeline_mode<synchronous>, transform_indices = @transform_2, window_bounds = array<i64: 1, 128>}, {transform_indices = @transform_3, window_bounds = array<i64: 64, 128>}]} {
    %c0 = arith.constant 0 : index
    %c0_0 = arith.constant 0 : index
    %0 = vector.load %arg1[%c0, %c0_0] : memref<64x128xf32, #tpu.memory_space<vmem>>, vector<64x128xf32>
    %c0_1 = arith.constant 0 : index
    %c0_2 = arith.constant 0 : index
    %1 = vector.load %arg2[%c0_1, %c0_2] : memref<1x128xf32, #tpu.memory_space<vmem>>, vector<1x128xf32>
    %2 = vector.broadcast %1 : vector<1x128xf32> to vector<64x128xf32>
    %3 = arith.mulf %0, %2 : vector<64x128xf32>
    %c0_3 = arith.constant 0 : index
    %c0_4 = arith.constant 0 : index
    %4 = vector.load %arg3[%c0_3, %c0_4] : memref<1x128xf32, #tpu.memory_space<vmem>>, vector<1x128xf32>
    %5 = vector.broadcast %4 : vector<1x128xf32> to vector<64x128xf32>
    %6 = arith.addf %3, %5 : vector<64x128xf32>
    %cst = arith.constant 0.000000e+00 : f32
    %7 = vector.broadcast %cst : f32 to vector<64x128xf32>
    %8 = arith.maximumf %6, %7 : vector<64x128xf32>
    %c0_5 = arith.constant 0 : index
    %c0_6 = arith.constant 0 : index
    %9 = vector.load %arg4[%c0_5, %c0_6] : memref<64x128xf32, #tpu.memory_space<vmem>>, vector<64x128xf32>
    tpu.vector_store %arg4[%c0_5, %c0_6], %8 {strides = array<i32>} : memref<64x128xf32, #tpu.memory_space<vmem>>, vector<64x128xf32>,
    return
  }
  func.func @transform_0(%arg0: i32) -> (i32, i32) {
    %c0_i32 = arith.constant 0 : i32
    %c0_i32_0 = arith.constant 0 : i32
    return %arg0, %c0_i32 : i32, i32
  }
  func.func @transform_1(%arg0: i32) -> (i32, i32) {
    %c0_i32 = arith.constant 0 : i32
    %c0_i32_0 = arith.constant 0 : i32
    %c0_i32_1 = arith.constant 0 : i32
    return %c0_i32, %c0_i32_0 : i32, i32
  }
  func.func @transform_2(%arg0: i32) -> (i32, i32) {
    %c0_i32 = arith.constant 0 : i32
    %c0_i32_0 = arith.constant 0 : i32
    %c0_i32_1 = arith.constant 0 : i32
    return %c0_i32, %c0_i32_0 : i32, i32
  }
  func.func @transform_3(%arg0: i32) -> (i32, i32) {
    %c0_i32 = arith.constant 0 : i32
    %c0_i32_0 = arith.constant 0 : i32
    return %arg0, %c0_i32 : i32, i32
  }
}

module attributes {stable_mosaic.version = 11 : i64} {
  func.func @_conv_kernel(%arg0: i32, %arg1: i32, %arg2: memref<1x10x10x64xf32, #tpu.memory_space<vmem>>, %arg3: memref<9x64x64xbf16, #tpu.memory_space<vmem>>, %arg4: memref<64x64xf32, #tpu.memory_space<vmem>>) attributes {dimension_semantics = [#tpu.dimension_semantics<parallel>, #tpu.dimension_semantics<parallel>], iteration_bounds = array<i64: 2, 1>, scalar_prefetch = 0 : i64, scratch_operands = 0 : i64, tpu.core_type = #tpu.core_type<tc>, window_params = [{transform_indices = @transform_0, window_bounds = array<i64: 1, 10, 10, 64>}, {pipeline_mode = #tpu.pipeline_mode<synchronous>, transform_indices = @transform_1, window_bounds = array<i64: 9, 64, 64>}, {transform_indices = @transform_2, window_bounds = array<i64: 64, 64>}]} {
    %c8_i32 = arith.constant 8 : i32
    %0 = arith.muli %arg1, %c8_i32 : i32
    %1 = tpu.assume_multiple %0, 8 : i32
    %cst = arith.constant 0.000000e+00 : f32
    %2 = vector.broadcast %cst : f32 to vector<64x64xf32>
    %c0_i32 = arith.constant 0 : i32
    %3 = arith.addi %1, %c0_i32 : i32
    %c0 = arith.constant 0 : index
    %4 = arith.index_cast %3 : i32 to index
    %c0_0 = arith.constant 0 : index
    %c0_1 = arith.constant 0 : index
    %5 = vector.load %arg2[%c0, %4, %c0_0, %c0_1] : memref<1x10x10x64xf32, #tpu.memory_space<vmem>>, vector<1x8x8x64xf32>
    %6 = vector.shape_cast %5 : vector<1x8x8x64xf32> to vector<8x8x64xf32>
    %7 = vector.shape_cast %6 : vector<8x8x64xf32> to vector<64x64xf32>
    %8 = arith.truncf %7 : vector<64x64xf32> to vector<64x64xbf16>
    %c0_2 = arith.constant 0 : index
    %c0_3 = arith.constant 0 : index
    %c0_4 = arith.constant 0 : index
    %9 = vector.load %arg3[%c0_2, %c0_3, %c0_4] : memref<9x64x64xbf16, #tpu.memory_space<vmem>>, vector<1x64x64xbf16>
    %10 = vector.shape_cast %9 : vector<1x64x64xbf16> to vector<64x64xbf16>
    %cst_5 = arith.constant dense<0.000000e+00> : vector<64x64xf32>
    %11 = tpu.matmul %8, %10, %cst_5 {dimension_numbers = #tpu.dot_dimension_numbers<[1], [0], [0], [1], [0, 0, 1, 1], [], []>} : vector<64x64xbf16>, vector<64x64xbf16>, vector<64x64xf32> -> vector<64x64xf32>
    %12 = arith.addf %2, %11 : vector<64x64xf32>
    %c0_i32_6 = arith.constant 0 : i32
    %13 = arith.addi %1, %c0_i32_6 : i32
    %c0_7 = arith.constant 0 : index
    %14 = arith.index_cast %13 : i32 to index
    %c1 = arith.constant 1 : index
    %c0_8 = arith.constant 0 : index
    %15 = vector.load %arg2[%c0_7, %14, %c1, %c0_8] : memref<1x10x10x64xf32, #tpu.memory_space<vmem>>, vector<1x8x8x64xf32>
    %16 = vector.shape_cast %15 : vector<1x8x8x64xf32> to vector<8x8x64xf32>
    %17 = vector.shape_cast %16 : vector<8x8x64xf32> to vector<64x64xf32>
    %18 = arith.truncf %17 : vector<64x64xf32> to vector<64x64xbf16>
    %c1_9 = arith.constant 1 : index
    %c0_10 = arith.constant 0 : index
    %c0_11 = arith.constant 0 : index
    %19 = vector.load %arg3[%c1_9, %c0_10, %c0_11] : memref<9x64x64xbf16, #tpu.memory_space<vmem>>, vector<1x64x64xbf16>
    %20 = vector.shape_cast %19 : vector<1x64x64xbf16> to vector<64x64xbf16>
    %cst_12 = arith.constant dense<0.000000e+00> : vector<64x64xf32>
    %21 = tpu.matmul %18, %20, %cst_12 {dimension_numbers = #tpu.dot_dimension_numbers<[1], [0], [0], [1], [0, 0, 1, 1], [], []>} : vector<64x64xbf16>, vector<64x64xbf16>, vector<64x64xf32> -> vector<64x64xf32>
    %22 = arith.addf %12, %21 : vector<64x64xf32>
    %c0_i32_13 = arith.constant 0 : i32
    %23 = arith.addi %1, %c0_i32_13 : i32
    %c0_14 = arith.constant 0 : index
    %24 = arith.index_cast %23 : i32 to index
    %c2 = arith.constant 2 : index
    %c0_15 = arith.constant 0 : index
    %25 = vector.load %arg2[%c0_14, %24, %c2, %c0_15] : memref<1x10x10x64xf32, #tpu.memory_space<vmem>>, vector<1x8x8x64xf32>
    %26 = vector.shape_cast %25 : vector<1x8x8x64xf32> to vector<8x8x64xf32>
    %27 = vector.shape_cast %26 : vector<8x8x64xf32> to vector<64x64xf32>
    %28 = arith.truncf %27 : vector<64x64xf32> to vector<64x64xbf16>
    %c2_16 = arith.constant 2 : index
    %c0_17 = arith.constant 0 : index
    %c0_18 = arith.constant 0 : index
    %29 = vector.load %arg3[%c2_16, %c0_17, %c0_18] : memref<9x64x64xbf16, #tpu.memory_space<vmem>>, vector<1x64x64xbf16>
    %30 = vector.shape_cast %29 : vector<1x64x64xbf16> to vector<64x64xbf16>
    %cst_19 = arith.constant dense<0.000000e+00> : vector<64x64xf32>
    %31 = tpu.matmul %28, %30, %cst_19 {dimension_numbers = #tpu.dot_dimension_numbers<[1], [0], [0], [1], [0, 0, 1, 1], [], []>} : vector<64x64xbf16>, vector<64x64xbf16>, vector<64x64xf32> -> vector<64x64xf32>
    %32 = arith.addf %22, %31 : vector<64x64xf32>
    %c1_i32 = arith.constant 1 : i32
    %33 = arith.addi %1, %c1_i32 : i32
    %c0_20 = arith.constant 0 : index
    %34 = arith.index_cast %33 : i32 to index
    %c0_21 = arith.constant 0 : index
    %c0_22 = arith.constant 0 : index
    %35 = vector.load %arg2[%c0_20, %34, %c0_21, %c0_22] : memref<1x10x10x64xf32, #tpu.memory_space<vmem>>, vector<1x8x8x64xf32>
    %36 = vector.shape_cast %35 : vector<1x8x8x64xf32> to vector<8x8x64xf32>
    %37 = vector.shape_cast %36 : vector<8x8x64xf32> to vector<64x64xf32>
    %38 = arith.truncf %37 : vector<64x64xf32> to vector<64x64xbf16>
    %c3 = arith.constant 3 : index
    %c0_23 = arith.constant 0 : index
    %c0_24 = arith.constant 0 : index
    %39 = vector.load %arg3[%c3, %c0_23, %c0_24] : memref<9x64x64xbf16, #tpu.memory_space<vmem>>, vector<1x64x64xbf16>
    %40 = vector.shape_cast %39 : vector<1x64x64xbf16> to vector<64x64xbf16>
    %cst_25 = arith.constant dense<0.000000e+00> : vector<64x64xf32>
    %41 = tpu.matmul %38, %40, %cst_25 {dimension_numbers = #tpu.dot_dimension_numbers<[1], [0], [0], [1], [0, 0, 1, 1], [], []>} : vector<64x64xbf16>, vector<64x64xbf16>, vector<64x64xf32> -> vector<64x64xf32>
    %42 = arith.addf %32, %41 : vector<64x64xf32>
    %c1_i32_26 = arith.constant 1 : i32
    %43 = arith.addi %1, %c1_i32_26 : i32
    %c0_27 = arith.constant 0 : index
    %44 = arith.index_cast %43 : i32 to index
    %c1_28 = arith.constant 1 : index
    %c0_29 = arith.constant 0 : index
    %45 = vector.load %arg2[%c0_27, %44, %c1_28, %c0_29] : memref<1x10x10x64xf32, #tpu.memory_space<vmem>>, vector<1x8x8x64xf32>
    %46 = vector.shape_cast %45 : vector<1x8x8x64xf32> to vector<8x8x64xf32>
    %47 = vector.shape_cast %46 : vector<8x8x64xf32> to vector<64x64xf32>
    %48 = arith.truncf %47 : vector<64x64xf32> to vector<64x64xbf16>
    %c4 = arith.constant 4 : index
    %c0_30 = arith.constant 0 : index
    %c0_31 = arith.constant 0 : index
    %49 = vector.load %arg3[%c4, %c0_30, %c0_31] : memref<9x64x64xbf16, #tpu.memory_space<vmem>>, vector<1x64x64xbf16>
    %50 = vector.shape_cast %49 : vector<1x64x64xbf16> to vector<64x64xbf16>
    %cst_32 = arith.constant dense<0.000000e+00> : vector<64x64xf32>
    %51 = tpu.matmul %48, %50, %cst_32 {dimension_numbers = #tpu.dot_dimension_numbers<[1], [0], [0], [1], [0, 0, 1, 1], [], []>} : vector<64x64xbf16>, vector<64x64xbf16>, vector<64x64xf32> -> vector<64x64xf32>
    %52 = arith.addf %42, %51 : vector<64x64xf32>
    %c1_i32_33 = arith.constant 1 : i32
    %53 = arith.addi %1, %c1_i32_33 : i32
    %c0_34 = arith.constant 0 : index
    %54 = arith.index_cast %53 : i32 to index
    %c2_35 = arith.constant 2 : index
    %c0_36 = arith.constant 0 : index
    %55 = vector.load %arg2[%c0_34, %54, %c2_35, %c0_36] : memref<1x10x10x64xf32, #tpu.memory_space<vmem>>, vector<1x8x8x64xf32>
    %56 = vector.shape_cast %55 : vector<1x8x8x64xf32> to vector<8x8x64xf32>
    %57 = vector.shape_cast %56 : vector<8x8x64xf32> to vector<64x64xf32>
    %58 = arith.truncf %57 : vector<64x64xf32> to vector<64x64xbf16>
    %c5 = arith.constant 5 : index
    %c0_37 = arith.constant 0 : index
    %c0_38 = arith.constant 0 : index
    %59 = vector.load %arg3[%c5, %c0_37, %c0_38] : memref<9x64x64xbf16, #tpu.memory_space<vmem>>, vector<1x64x64xbf16>
    %60 = vector.shape_cast %59 : vector<1x64x64xbf16> to vector<64x64xbf16>
    %cst_39 = arith.constant dense<0.000000e+00> : vector<64x64xf32>
    %61 = tpu.matmul %58, %60, %cst_39 {dimension_numbers = #tpu.dot_dimension_numbers<[1], [0], [0], [1], [0, 0, 1, 1], [], []>} : vector<64x64xbf16>, vector<64x64xbf16>, vector<64x64xf32> -> vector<64x64xf32>
    %62 = arith.addf %52, %61 : vector<64x64xf32>
    %c2_i32 = arith.constant 2 : i32
    %63 = arith.addi %1, %c2_i32 : i32
    %c0_40 = arith.constant 0 : index
    %64 = arith.index_cast %63 : i32 to index
    %c0_41 = arith.constant 0 : index
    %c0_42 = arith.constant 0 : index
    %65 = vector.load %arg2[%c0_40, %64, %c0_41, %c0_42] : memref<1x10x10x64xf32, #tpu.memory_space<vmem>>, vector<1x8x8x64xf32>
    %66 = vector.shape_cast %65 : vector<1x8x8x64xf32> to vector<8x8x64xf32>
    %67 = vector.shape_cast %66 : vector<8x8x64xf32> to vector<64x64xf32>
    %68 = arith.truncf %67 : vector<64x64xf32> to vector<64x64xbf16>
    %c6 = arith.constant 6 : index
    %c0_43 = arith.constant 0 : index
    %c0_44 = arith.constant 0 : index
    %69 = vector.load %arg3[%c6, %c0_43, %c0_44] : memref<9x64x64xbf16, #tpu.memory_space<vmem>>, vector<1x64x64xbf16>
    %70 = vector.shape_cast %69 : vector<1x64x64xbf16> to vector<64x64xbf16>
    %cst_45 = arith.constant dense<0.000000e+00> : vector<64x64xf32>
    %71 = tpu.matmul %68, %70, %cst_45 {dimension_numbers = #tpu.dot_dimension_numbers<[1], [0], [0], [1], [0, 0, 1, 1], [], []>} : vector<64x64xbf16>, vector<64x64xbf16>, vector<64x64xf32> -> vector<64x64xf32>
    %72 = arith.addf %62, %71 : vector<64x64xf32>
    %c2_i32_46 = arith.constant 2 : i32
    %73 = arith.addi %1, %c2_i32_46 : i32
    %c0_47 = arith.constant 0 : index
    %74 = arith.index_cast %73 : i32 to index
    %c1_48 = arith.constant 1 : index
    %c0_49 = arith.constant 0 : index
    %75 = vector.load %arg2[%c0_47, %74, %c1_48, %c0_49] : memref<1x10x10x64xf32, #tpu.memory_space<vmem>>, vector<1x8x8x64xf32>
    %76 = vector.shape_cast %75 : vector<1x8x8x64xf32> to vector<8x8x64xf32>
    %77 = vector.shape_cast %76 : vector<8x8x64xf32> to vector<64x64xf32>
    %78 = arith.truncf %77 : vector<64x64xf32> to vector<64x64xbf16>
    %c7 = arith.constant 7 : index
    %c0_50 = arith.constant 0 : index
    %c0_51 = arith.constant 0 : index
    %79 = vector.load %arg3[%c7, %c0_50, %c0_51] : memref<9x64x64xbf16, #tpu.memory_space<vmem>>, vector<1x64x64xbf16>
    %80 = vector.shape_cast %79 : vector<1x64x64xbf16> to vector<64x64xbf16>
    %cst_52 = arith.constant dense<0.000000e+00> : vector<64x64xf32>
    %81 = tpu.matmul %78, %80, %cst_52 {dimension_numbers = #tpu.dot_dimension_numbers<[1], [0], [0], [1], [0, 0, 1, 1], [], []>} : vector<64x64xbf16>, vector<64x64xbf16>, vector<64x64xf32> -> vector<64x64xf32>
    %82 = arith.addf %72, %81 : vector<64x64xf32>
    %c2_i32_53 = arith.constant 2 : i32
    %83 = arith.addi %1, %c2_i32_53 : i32
    %c0_54 = arith.constant 0 : index
    %84 = arith.index_cast %83 : i32 to index
    %c2_55 = arith.constant 2 : index
    %c0_56 = arith.constant 0 : index
    %85 = vector.load %arg2[%c0_54, %84, %c2_55, %c0_56] : memref<1x10x10x64xf32, #tpu.memory_space<vmem>>, vector<1x8x8x64xf32>
    %86 = vector.shape_cast %85 : vector<1x8x8x64xf32> to vector<8x8x64xf32>
    %87 = vector.shape_cast %86 : vector<8x8x64xf32> to vector<64x64xf32>
    %88 = arith.truncf %87 : vector<64x64xf32> to vector<64x64xbf16>
    %c8 = arith.constant 8 : index
    %c0_57 = arith.constant 0 : index
    %c0_58 = arith.constant 0 : index
    %89 = vector.load %arg3[%c8, %c0_57, %c0_58] : memref<9x64x64xbf16, #tpu.memory_space<vmem>>, vector<1x64x64xbf16>
    %90 = vector.shape_cast %89 : vector<1x64x64xbf16> to vector<64x64xbf16>
    %cst_59 = arith.constant dense<0.000000e+00> : vector<64x64xf32>
    %91 = tpu.matmul %88, %90, %cst_59 {dimension_numbers = #tpu.dot_dimension_numbers<[1], [0], [0], [1], [0, 0, 1, 1], [], []>} : vector<64x64xbf16>, vector<64x64xbf16>, vector<64x64xf32> -> vector<64x64xf32>
    %92 = arith.addf %82, %91 : vector<64x64xf32>
    %c0_60 = arith.constant 0 : index
    %c0_61 = arith.constant 0 : index
    %93 = vector.load %arg4[%c0_60, %c0_61] : memref<64x64xf32, #tpu.memory_space<vmem>>, vector<64x64xf32>
    tpu.vector_store %arg4[%c0_60, %c0_61], %92 {strides = array<i32>} : memref<64x64xf32, #tpu.memory_space<vmem>>, vector<64x64xf32>,
    return
  }
  func.func @transform_0(%arg0: i32, %arg1: i32) -> (i32, i32, i32, i32) {
    %c0_i32 = arith.constant 0 : i32
    %c0_i32_0 = arith.constant 0 : i32
    %c0_i32_1 = arith.constant 0 : i32
    %c0_i32_2 = arith.constant 0 : i32
    return %arg0, %c0_i32, %c0_i32_0, %c0_i32_1 : i32, i32, i32, i32
  }
  func.func @transform_1(%arg0: i32, %arg1: i32) -> (i32, i32, i32) {
    %c0_i32 = arith.constant 0 : i32
    %c0_i32_0 = arith.constant 0 : i32
    %c0_i32_1 = arith.constant 0 : i32
    %c0_i32_2 = arith.constant 0 : i32
    return %c0_i32, %c0_i32_0, %c0_i32_1 : i32, i32, i32
  }
  func.func @transform_2(%arg0: i32, %arg1: i32) -> (i32, i32) {
    %c1_i32 = arith.constant 1 : i32
    %0 = arith.muli %arg0, %c1_i32 : i32
    %1 = arith.addi %0, %arg1 : i32
    %c0_i32 = arith.constant 0 : i32
    %c0_i32_0 = arith.constant 0 : i32
    return %1, %c0_i32 : i32, i32
  }
}

module attributes {stable_mosaic.version = 11 : i64} {
  func.func @_conv_kernel(%arg0: i32, %arg1: i32, %arg2: memref<1x8x8x32xf32, #tpu.memory_space<vmem>>, %arg3: memref<1x32x64xbf16, #tpu.memory_space<vmem>>, %arg4: memref<64x64xf32, #tpu.memory_space<vmem>>) attributes {dimension_semantics = [#tpu.dimension_semantics<parallel>, #tpu.dimension_semantics<parallel>], iteration_bounds = array<i64: 2, 1>, scalar_prefetch = 0 : i64, scratch_operands = 0 : i64, tpu.core_type = #tpu.core_type<tc>, window_params = [{transform_indices = @transform_0, window_bounds = array<i64: 1, 8, 8, 32>}, {pipeline_mode = #tpu.pipeline_mode<synchronous>, transform_indices = @transform_1, window_bounds = array<i64: 1, 32, 64>}, {transform_indices = @transform_2, window_bounds = array<i64: 64, 64>}]} {
    %c8_i32 = arith.constant 8 : i32
    %0 = arith.muli %arg1, %c8_i32 : i32
    %1 = tpu.assume_multiple %0, 8 : i32
    %cst = arith.constant 0.000000e+00 : f32
    %2 = vector.broadcast %cst : f32 to vector<64x64xf32>
    %c0_i32 = arith.constant 0 : i32
    %3 = arith.addi %1, %c0_i32 : i32
    %c0 = arith.constant 0 : index
    %4 = arith.index_cast %3 : i32 to index
    %c0_0 = arith.constant 0 : index
    %c0_1 = arith.constant 0 : index
    %5 = vector.load %arg2[%c0, %4, %c0_0, %c0_1] : memref<1x8x8x32xf32, #tpu.memory_space<vmem>>, vector<1x8x8x32xf32>
    %6 = vector.shape_cast %5 : vector<1x8x8x32xf32> to vector<8x8x32xf32>
    %7 = vector.shape_cast %6 : vector<8x8x32xf32> to vector<64x32xf32>
    %8 = arith.truncf %7 : vector<64x32xf32> to vector<64x32xbf16>
    %c0_2 = arith.constant 0 : index
    %c0_3 = arith.constant 0 : index
    %c0_4 = arith.constant 0 : index
    %9 = vector.load %arg3[%c0_2, %c0_3, %c0_4] : memref<1x32x64xbf16, #tpu.memory_space<vmem>>, vector<1x32x64xbf16>
    %10 = vector.shape_cast %9 : vector<1x32x64xbf16> to vector<32x64xbf16>
    %cst_5 = arith.constant dense<0.000000e+00> : vector<64x64xf32>
    %11 = tpu.matmul %8, %10, %cst_5 {dimension_numbers = #tpu.dot_dimension_numbers<[1], [0], [0], [1], [0, 0, 1, 1], [], []>} : vector<64x32xbf16>, vector<32x64xbf16>, vector<64x64xf32> -> vector<64x64xf32>
    %12 = arith.addf %2, %11 : vector<64x64xf32>
    %c0_6 = arith.constant 0 : index
    %c0_7 = arith.constant 0 : index
    %13 = vector.load %arg4[%c0_6, %c0_7] : memref<64x64xf32, #tpu.memory_space<vmem>>, vector<64x64xf32>
    tpu.vector_store %arg4[%c0_6, %c0_7], %12 {strides = array<i32>} : memref<64x64xf32, #tpu.memory_space<vmem>>, vector<64x64xf32>,
    return
  }
  func.func @transform_0(%arg0: i32, %arg1: i32) -> (i32, i32, i32, i32) {
    %c0_i32 = arith.constant 0 : i32
    %c0_i32_0 = arith.constant 0 : i32
    %c0_i32_1 = arith.constant 0 : i32
    %c0_i32_2 = arith.constant 0 : i32
    return %arg0, %c0_i32, %c0_i32_0, %c0_i32_1 : i32, i32, i32, i32
  }
  func.func @transform_1(%arg0: i32, %arg1: i32) -> (i32, i32, i32) {
    %c0_i32 = arith.constant 0 : i32
    %c0_i32_0 = arith.constant 0 : i32
    %c0_i32_1 = arith.constant 0 : i32
    %c0_i32_2 = arith.constant 0 : i32
    return %c0_i32, %c0_i32_0, %c0_i32_1 : i32, i32, i32
  }
  func.func @transform_2(%arg0: i32, %arg1: i32) -> (i32, i32) {
    %c1_i32 = arith.constant 1 : i32
    %0 = arith.muli %arg0, %c1_i32 : i32
    %1 = arith.addi %0, %arg1 : i32
    %c0_i32 = arith.constant 0 : i32
    %c0_i32_0 = arith.constant 0 : i32
    return %1, %c0_i32 : i32, i32
  }
}

module attributes {stable_mosaic.version = 11 : i64} {
  func.func @_bn_apply_kernel(%arg0: i32, %arg1: memref<64x128xf32, #tpu.memory_space<vmem>>, %arg2: memref<1x128xf32, #tpu.memory_space<vmem>>, %arg3: memref<1x128xf32, #tpu.memory_space<vmem>>, %arg4: memref<64x128xf32, #tpu.memory_space<vmem>>) attributes {dimension_semantics = [#tpu.dimension_semantics<parallel>], iteration_bounds = array<i64: 1>, scalar_prefetch = 0 : i64, scratch_operands = 0 : i64, tpu.core_type = #tpu.core_type<tc>, window_params = [{transform_indices = @transform_0, window_bounds = array<i64: 64, 128>}, {pipeline_mode = #tpu.pipeline_mode<synchronous>, transform_indices = @transform_1, window_bounds = array<i64: 1, 128>}, {pipeline_mode = #tpu.pipeline_mode<synchronous>, transform_indices = @transform_2, window_bounds = array<i64: 1, 128>}, {transform_indices = @transform_3, window_bounds = array<i64: 64, 128>}]} {
    %c0 = arith.constant 0 : index
    %c0_0 = arith.constant 0 : index
    %0 = vector.load %arg1[%c0, %c0_0] : memref<64x128xf32, #tpu.memory_space<vmem>>, vector<64x128xf32>
    %c0_1 = arith.constant 0 : index
    %c0_2 = arith.constant 0 : index
    %1 = vector.load %arg2[%c0_1, %c0_2] : memref<1x128xf32, #tpu.memory_space<vmem>>, vector<1x128xf32>
    %2 = vector.broadcast %1 : vector<1x128xf32> to vector<64x128xf32>
    %3 = arith.mulf %0, %2 : vector<64x128xf32>
    %c0_3 = arith.constant 0 : index
    %c0_4 = arith.constant 0 : index
    %4 = vector.load %arg3[%c0_3, %c0_4] : memref<1x128xf32, #tpu.memory_space<vmem>>, vector<1x128xf32>
    %5 = vector.broadcast %4 : vector<1x128xf32> to vector<64x128xf32>
    %6 = arith.addf %3, %5 : vector<64x128xf32>
    %c0_5 = arith.constant 0 : index
    %c0_6 = arith.constant 0 : index
    %7 = vector.load %arg4[%c0_5, %c0_6] : memref<64x128xf32, #tpu.memory_space<vmem>>, vector<64x128xf32>
    tpu.vector_store %arg4[%c0_5, %c0_6], %6 {strides = array<i32>} : memref<64x128xf32, #tpu.memory_space<vmem>>, vector<64x128xf32>,
    return
  }
  func.func @transform_0(%arg0: i32) -> (i32, i32) {
    %c0_i32 = arith.constant 0 : i32
    %c0_i32_0 = arith.constant 0 : i32
    return %arg0, %c0_i32 : i32, i32
  }
  func.func @transform_1(%arg0: i32) -> (i32, i32) {
    %c0_i32 = arith.constant 0 : i32
    %c0_i32_0 = arith.constant 0 : i32
    %c0_i32_1 = arith.constant 0 : i32
    return %c0_i32, %c0_i32_0 : i32, i32
  }
  func.func @transform_2(%arg0: i32) -> (i32, i32) {
    %c0_i32 = arith.constant 0 : i32
    %c0_i32_0 = arith.constant 0 : i32
    %c0_i32_1 = arith.constant 0 : i32
    return %c0_i32, %c0_i32_0 : i32, i32
  }
  func.func @transform_3(%arg0: i32) -> (i32, i32) {
    %c0_i32 = arith.constant 0 : i32
    %c0_i32_0 = arith.constant 0 : i32
    return %arg0, %c0_i32 : i32, i32
  }
}

module attributes {stable_mosaic.version = 11 : i64} {
  func.func @_bn_apply_kernel(%arg0: i32, %arg1: memref<64x128xf32, #tpu.memory_space<vmem>>, %arg2: memref<64x128xf32, #tpu.memory_space<vmem>>, %arg3: memref<1x128xf32, #tpu.memory_space<vmem>>, %arg4: memref<1x128xf32, #tpu.memory_space<vmem>>, %arg5: memref<64x128xf32, #tpu.memory_space<vmem>>) attributes {dimension_semantics = [#tpu.dimension_semantics<parallel>], iteration_bounds = array<i64: 1>, scalar_prefetch = 0 : i64, scratch_operands = 0 : i64, tpu.core_type = #tpu.core_type<tc>, window_params = [{transform_indices = @transform_0, window_bounds = array<i64: 64, 128>}, {transform_indices = @transform_1, window_bounds = array<i64: 64, 128>}, {pipeline_mode = #tpu.pipeline_mode<synchronous>, transform_indices = @transform_2, window_bounds = array<i64: 1, 128>}, {pipeline_mode = #tpu.pipeline_mode<synchronous>, transform_indices = @transform_3, window_bounds = array<i64: 1, 128>}, {transform_indices = @transform_4, window_bounds = array<i64: 64, 128>}]} {
    %c0 = arith.constant 0 : index
    %c0_0 = arith.constant 0 : index
    %0 = vector.load %arg1[%c0, %c0_0] : memref<64x128xf32, #tpu.memory_space<vmem>>, vector<64x128xf32>
    %c0_1 = arith.constant 0 : index
    %c0_2 = arith.constant 0 : index
    %1 = vector.load %arg3[%c0_1, %c0_2] : memref<1x128xf32, #tpu.memory_space<vmem>>, vector<1x128xf32>
    %2 = vector.broadcast %1 : vector<1x128xf32> to vector<64x128xf32>
    %3 = arith.mulf %0, %2 : vector<64x128xf32>
    %c0_3 = arith.constant 0 : index
    %c0_4 = arith.constant 0 : index
    %4 = vector.load %arg4[%c0_3, %c0_4] : memref<1x128xf32, #tpu.memory_space<vmem>>, vector<1x128xf32>
    %5 = vector.broadcast %4 : vector<1x128xf32> to vector<64x128xf32>
    %6 = arith.addf %3, %5 : vector<64x128xf32>
    %c0_5 = arith.constant 0 : index
    %c0_6 = arith.constant 0 : index
    %7 = vector.load %arg2[%c0_5, %c0_6] : memref<64x128xf32, #tpu.memory_space<vmem>>, vector<64x128xf32>
    %8 = arith.addf %6, %7 : vector<64x128xf32>
    %cst = arith.constant 0.000000e+00 : f32
    %9 = vector.broadcast %cst : f32 to vector<64x128xf32>
    %10 = arith.maximumf %8, %9 : vector<64x128xf32>
    %c0_7 = arith.constant 0 : index
    %c0_8 = arith.constant 0 : index
    %11 = vector.load %arg5[%c0_7, %c0_8] : memref<64x128xf32, #tpu.memory_space<vmem>>, vector<64x128xf32>
    tpu.vector_store %arg5[%c0_7, %c0_8], %10 {strides = array<i32>} : memref<64x128xf32, #tpu.memory_space<vmem>>, vector<64x128xf32>,
    return
  }
  func.func @transform_0(%arg0: i32) -> (i32, i32) {
    %c0_i32 = arith.constant 0 : i32
    %c0_i32_0 = arith.constant 0 : i32
    return %arg0, %c0_i32 : i32, i32
  }
  func.func @transform_1(%arg0: i32) -> (i32, i32) {
    %c0_i32 = arith.constant 0 : i32
    %c0_i32_0 = arith.constant 0 : i32
    return %arg0, %c0_i32 : i32, i32
  }
  func.func @transform_2(%arg0: i32) -> (i32, i32) {
    %c0_i32 = arith.constant 0 : i32
    %c0_i32_0 = arith.constant 0 : i32
    %c0_i32_1 = arith.constant 0 : i32
    return %c0_i32, %c0_i32_0 : i32, i32
  }
  func.func @transform_3(%arg0: i32) -> (i32, i32) {
    %c0_i32 = arith.constant 0 : i32
    %c0_i32_0 = arith.constant 0 : i32
    %c0_i32_1 = arith.constant 0 : i32
    return %c0_i32, %c0_i32_0 : i32, i32
  }
  func.func @transform_4(%arg0: i32) -> (i32, i32) {
    %c0_i32 = arith.constant 0 : i32
    %c0_i32_0 = arith.constant 0 : i32
    return %arg0, %c0_i32 : i32, i32
  }
}

</mosaic_0001>

<bundles_post_ra>
// kernel: squeeze.10
= control target key start
LH: loop header
LB: loop body
LE: loop exit
PB: predicated region body
PF: predicated region fallthrough
CT: control target
= control target key end

     0   :  { %vm8_vm0 = vcmask 523264   ;;  %s42_s0 = inlined_call_operand.vmem [shape: f32[128], index: 0, kind: input, shape index: {}]   ;;  %s43_s1 = inlined_call_operand.vmem [shape: f32[2,64], index: 1, kind: output, shape index: {}]  }
   0x1   :  { %v5_v0 = vld [vmem:[%s42_s0] sm:$0x1]  ;;  %s25_s0 = smov 64  }
   0x2   :  { %6 = vst [vmem:[#allocation1] sm:$0x1] %v5_v0 }
   0x9   :  { %v10_v1 = vld [vmem:[#allocation1] sm:$0x1]  }
   0xa   :  { %v7_v2 = vld [vmem:[#allocation1] sm:$0x1]   ;;  %11 = vrot.lane.b32.xlu0 %v10_v1, %s25_s0 }
   0xb   :  { %9 = vst.msk [vmem:[#allocation0] sm:$0x1] %vm8_vm0, %v7_v2  }
  0x7c   :  { %v12_v3 = vpop.permute.xlu0 %11  }
  0x7d   :  { %15 = vst.msk [vmem:[#allocation0 + $0x1] sm:$0x1] %vm8_vm0, %v12_v3  }
  0x84   :  { %v20_v4 = vld [vmem:[#allocation0] sm:$0x3] }
  0x85   :  { %23 = vst [vmem:[%s43_s1] sm:$0x3] %v20_v4 }

// kernel: fwd.16
= control target key start
LH: loop header
LB: loop body
LE: loop exit
PB: predicated region body
PF: predicated region fallthrough
CT: control target
= control target key end

     0   :  { %v65_v0 = vmov 0.0   ;;  %vm55_vm0 = vcmask 1040384   ;;  %s109_s1 = inlined_call_operand.vmem [shape: f32[2,128], index: 1, kind: output, shape index: {}]   ;;  %s110_s0 = inlined_call_operand.vmem [shape: f32[64,128], index: 0, kind: input, shape index: {}]  }
   0x1   :  { %12 = vst [vmem:[%s109_s1] sm:$0x3] %v65_v0  ;;  %v13_v1 = vld [vmem:[%s110_s0] sm:$0xff]  ;;  %v14_v2 = vld [vmem:[%s110_s0 + $0x8] sm:$0xff]  ;;  %v15_v3 = vld [vmem:[%s110_s0 + $0x10] sm:$0xff] }
   0x2   :  { %v16_v4 = vld [vmem:[%s110_s0 + $0x18] sm:$0xff]  ;;  %v21_v5 = vadd.f32 %v14_v2, %v13_v1  ;;  %v34_v6 = vmul.f32 %v13_v1, %v13_v1  ;;  %v35_v7 = vmul.f32 %v14_v2, %v14_v2  ;;  %v36_v8 = vmul.f32 %v15_v3, %v15_v3  ;;  %v17_v9 = vld [vmem:[%s110_s0 + $0x20] sm:$0xff]  ;;  %v18_v13 = vld [vmem:[%s110_s0 + $0x28] sm:$0xff] }
   0x3   :  { %v37_v11 = vmul.f32 %v16_v4, %v16_v4  ;;  %v38_v15 = vmul.f32 %v17_v9, %v17_v9  ;;  %v19_v17 = vld [vmem:[%s110_s0 + $0x30] sm:$0xff]  ;;  %v39_v19 = vmul.f32 %v18_v13, %v18_v13  ;;  %v20_v21 = vld [vmem:[%s110_s0 + $0x38] sm:$0xff] }
   0x4   :  { %v22_v10 = vadd.f32 %v21_v5, %v15_v3  ;;  %v42_v12 = vadd.f32 %v35_v7, %v34_v6  ;;  %v40_v23 = vmul.f32 %v19_v17, %v19_v17  ;;  %v41_v26 = vmul.f32 %v20_v21, %v20_v21 }
   0x6   :  { %v23_v14 = vadd.f32 %v22_v10, %v16_v4  ;;  %v43_v16 = vadd.f32 %v42_v12, %v36_v8 }
   0x8   :  { %v24_v18 = vadd.f32 %v23_v14, %v17_v9  ;;  %v44_v20 = vadd.f32 %v43_v16, %v37_v11  ;;  %v57_v43 = vld [vmem:[%s109_s1] sm:$0x3] }
   0xa   :  { %v25_v22 = vadd.f32 %v24_v18, %v18_v13  ;;  %v45_v24 = vadd.f32 %v44_v20, %v38_v15 }
   0xc   :  { %v26_v25 = vadd.f32 %v25_v22, %v19_v17  ;;  %v46_v27 = vadd.f32 %v45_v24, %v39_v19 }
   0xe   :  { %v27_v28 = vadd.f32 %v26_v25, %v20_v21  ;;  %v47_v29 = vadd.f32 %v46_v27, %v40_v23 }
  0x10   :  { %v28_v30 = vrot.slane %v27_v28, 4  ;;  %v48_v31 = vadd.f32 %v47_v29, %v41_v26 }
  0x12   :  { %v29_v32 = vadd.f32 %v28_v30, %v27_v28  ;;  %v49_v33 = vrot.slane %v48_v31, 4 }
  0x14   :  { %v30_v34 = vrot.slane %v29_v32, 2  ;;  %v50_v35 = vadd.f32 %v49_v33, %v48_v31 }
  0x16   :  { %v31_v36 = vadd.f32 %v30_v34, %v29_v32  ;;  %v51_v37 = vrot.slane %v50_v35, 2 }
  0x18   :  { %v32_v38 = vrot.slane %v31_v36, 1  ;;  %v52_v39 = vadd.f32 %v51_v37, %v50_v35 }
  0x1a   :  { %v33_v40 = vadd.f32 %v32_v38, %v31_v36  ;;  %v53_v41 = vrot.slane %v52_v39, 1 }
  0x1c   :  { %v54_v42 = vadd.f32 %v53_v41, %v52_v39 }
  0x1e   :  { %v56_v44 = vsel %vm55_vm0, %v33_v40, %v54_v42 }
  0x1f   :  { %v58_v45 = vadd.f32 %v57_v43, %v56_v44 }
  0x21   :  { %59 = vst [vmem:[%s109_s1] sm:$0x3] %v58_v45 }

// kernel: tile.53
= control target key start
LH: loop header
LB: loop body
LE: loop exit
PB: predicated region body
PF: predicated region fallthrough
CT: control target
= control target key end

     0   :  { %s22_s0 = inlined_call_operand.vmem [shape: f32[64], index: 0, kind: input, shape index: {}]   ;;  %s23_s1 = inlined_call_operand.vmem [shape: f32[2,64], index: 1, kind: output, shape index: {}]  }
   0x1   :  { %v4_v0 = vld [vmem:[%s22_s0] ss:$0 sm:$0xff] }
   0x2   :  { %5 = vst [vmem:[%s23_s1] sm:$0x3] %v4_v0 }

// kernel: tile.54
= control target key start
LH: loop header
LB: loop body
LE: loop exit
PB: predicated region body
PF: predicated region fallthrough
CT: control target
= control target key end

     0   :  { %vm8_vm0 = vcmask 523264   ;;  %vm14_vm1 = vcmask 1048064   ;;  %s42_s0 = inlined_call_operand.vmem [shape: f32[2,64], index: 0, kind: input, shape index: {}]   ;;  %s43_s1 = inlined_call_operand.vmem [shape: f32[1,128], index: 1, kind: output, shape index: {}]  }
   0x1   :  { %v5_v0 = vld [vmem:[%s42_s0] sm:$0x3]  ;;  %s25_s0 = smov 64  }
   0x2   :  { %6 = vst [vmem:[#allocation1] sm:$0x3] %v5_v0 }
   0x9   :  { %v11_v1 = vld [vmem:[#allocation1 + $0x1] sm:$0x1]   ;;  %v7_v2 = vld [vmem:[#allocation1] sm:$0x1]  }
   0xa   :  { %12 = vrot.lane.b32.xlu0 %v11_v1, %s25_s0  ;;  %9 = vst.msk [vmem:[#allocation0] sm:$0x1] %vm8_vm0, %v7_v2  }
  0x7c   :  { %v13_v3 = vpop.permute.xlu0 %12  }
  0x7d   :  { %15 = vst.msk [vmem:[#allocation0] sm:$0x1] %vm14_vm1, %v13_v3  }
  0x84   :  { %v20_v4 = vld [vmem:[#allocation0] sm:$0x1] }
  0x85   :  { %23 = vst [vmem:[%s43_s1] sm:$0x1] %v20_v4 }

// kernel: fwd.15
= control target key start
LH: loop header
LB: loop body
LE: loop exit
PB: predicated region body
PF: predicated region fallthrough
CT: control target
= control target key end

     0   :  { %s1689_s9 = smov 0   ;;  %s1691_s10 = smov 0   ;;  %s1998_s0 = inlined_call_operand.vmem [shape: f32[8,9,9,32], index: 0, kind: input, shape index: {}]   ;;  %s1999_s1 = inlined_call_operand.vmem [shape: bf16[9,32,64], index: 1, kind: input, shape index: {}]   ;;  %s2000_s2 = inlined_call_operand.vmem [shape: f32[128,64], index: 2, kind: output, shape index: {}]  }
   0x1   :  { %s1693_s11 = smov 0  }
   0x2 LB: > { %s24_s12 = sadd.s32 1, %s1668_s10  ;;  %p1292_p0 = scmp.ge.s32.totalorder %s1672_s11, 1  ;;  %s1672_s11 = sphi %s1693_s11, %s12_s11   ;;  %s1668_s10 = sphi %s1691_s10, %s2003_s10   ;;  %s1664_s9 = sphi %s1689_s9, %s2002_s9  }
   0x3   : > { %p26_p1 = scmp.ge.s32.totalorder %s24_s12, 2  ;;  %p128_p2 = scmp.lt.s32.totalorder %s1672_s11, 3 }
   0x5   : > { %s2005_s12 = smov (%p26_p1, %s24_s12), 0  ;;  %p129_p3 = pnand %p1292_p0, %p128_p2 }
   0x6   : > { %s1293_s15 = sshll.u32 (!%p129_p3), %s1664_s9, 2 }
   0x7   : > { %132 = sbr.rel (%p129_p3) target bundleno = 290 (0x122), region = 28  ;;  %p153_p4 = scmp.lt.s32.totalorder (!%p129_p3), %s1293_s15, 7 }
   0xc   : > { %v1632_v0 = vld [vmem:[%s1999_s1 + $0x18] sm:$0xff]   ;;  %v1633_v1 = vld [vmem:[%s1999_s1 + $0x10] sm:$0xff]   ;;  %s2007_s15 = smov (!%p153_p4, %s1293_s15), 7  ;;  %v1634_v2 = vld [vmem:[%s1999_s1 + $0x8] sm:$0xff]   ;;  %vm218_vm0 = vcmask 261120   ;;  %vm1192_vm1 = vcmask 523264  }
   0xd   : > { %1603 = vmatprep.subr.bf16.mxu1 %v1632_v0  ;;  %1495 = vmatprep.subr.bf16.mxu0 %v1632_v0  ;;  %v1635_v3 = vld [vmem:[%s1999_s1 + $0x28] sm:$0xff]   ;;  %s1607_s22 = smul.u32 144, %s2007_s15  ;;  %v1637_v7 = vld [vmem:[%s1999_s1 + $0x20] sm:$0xff]   ;;  %v1638_v24 = vld [vmem:[%s1999_s1 + $0x38] sm:$0xff]  }
   0xe   : > { %1605 = vmatpush3.bf16.msra.mxu1 %v1632_v0  ;;  %1496 = vmatpush3.bf16.msra.mxu0 %v1632_v0  ;;  %v1636_v12 = vld [vmem:[%s1999_s1] sm:$0xff]   ;;  %v1639_v27 = vld [vmem:[%s1999_s1 + $0x48] sm:$0xff]   ;;  %v1640_v38 = vld [vmem:[%s1999_s1 + $0x30] sm:$0xff]  }
   0xf   : > { %1604 = vmatprep.subr.bf16.mxu1 %v1633_v1  ;;  %1497 = vmatprep.subr.bf16.mxu0 %v1633_v1  ;;  %s1725_s25 = scalar_lea.vmem %s1998_s0, %s1607_s22  ;;  %v1641_v42 = vld [vmem:[%s1999_s1 + $0x40] sm:$0xff]   ;;  %v1643_v46 = vld [vmem:[%s1999_s1 + $0x68] sm:$0xff]   ;;  %v1642_v49 = vld [vmem:[%s1999_s1 + $0x58] sm:$0xff]  }
  0x10   : > { %v1297_v4 = vld [vmem:[%s1725_s25 + $0x90] sm:$0xff]  ;;  %v1729_v5 = vld [vmem:[%s1725_s25 + $0xa0] sm:$0xff] }
  0x11   : > { %v1732_v6 = vld [vmem:[%s1725_s25 + $0xd0] sm:$0xff]  ;;  %v197_v8 = vpack.c.bf16 %v1729_v5, %v1297_v4  ;;  %v1739_v9 = vld [vmem:[%s1725_s25 + $0xe0] sm:$0xff] }
  0x12   : > { %1606 = vmatpush3.bf16.msra.mxu1 %v1633_v1  ;;  %1498 = vmatpush3.bf16.msra.mxu0 %v1633_v1  ;;  %v1742_v10 = vld [vmem:[%s1725_s25 + $0xb0] sm:$0xff]  ;;  %v1745_v11 = vld [vmem:[%s1725_s25 + $0xc0] sm:$0xff]  ;;  %v199_v13 = vpack.c.bf16 %v1739_v9, %v1732_v6 }
  0x13   : > { %1507 = vmatprep.subr.bf16.mxu1 %v1634_v2  ;;  %1519 = vmatprep.subr.bf16.mxu0 %v1635_v3  ;;  %v198_v14 = vpack.c.bf16 %v1745_v11, %v1742_v10  ;;  %v1755_v15 = vld [vmem:[%s1725_s25 + $0xf0] sm:$0xff]  ;;  %v1758_v16 = vld [vmem:[%s1725_s25 + $0x100] sm:$0xff] }
  0x14   : > { %v171_v17 = vld [vmem:[%s1725_s25] sm:$0xff]  ;;  %1499 = vmatprep.mubr.msk.bf16.mxu0 %vm218_vm0, %v197_v8  ;;  %v200_v18 = vpack.c.bf16 %v1758_v16, %v1755_v15  ;;  %v1765_v19 = vld [vmem:[%s1725_s25 + $0x10] sm:$0xff]  ;;  %1503 = vmatprep.mubr.msk.bf16.mxu1 %vm218_vm0, %v199_v13 }
  0x15   : > { %v385_v20 = vld [vmem:[%s1725_s25 + $0x1] sm:$0xff]  ;;  %v1769_v21 = vld [vmem:[%s1725_s25 + $0x11] sm:$0xff]  ;;  %1500 = vmatmul.mubr.msk.bf16.vlgmr.msra.gmra.mxu0 %vm218_vm0, %v198_v14  ;;  %v179_v22 = vpack.c.bf16 %v1765_v19, %v171_v17 }
  0x16   : > { %v393_v23 = vpack.c.bf16 %v1769_v21, %v385_v20  ;;  %1504 = vmatmul.mubr.msk.bf16.vlgmr.msra.gmra.mxu1 %vm218_vm0, %v200_v18  ;;  %1520 = vmatpush3.bf16.msra.mxu0 %v1635_v3  ;;  %v1780_v25 = vld [vmem:[%s1725_s25 + $0x21] sm:$0xff]  ;;  %v1783_v26 = vld [vmem:[%s1725_s25 + $0x31] sm:$0xff] }
  0x17   : > { %1508 = vmatpush3.bf16.msra.mxu1 %v1634_v2  ;;  %1521 = vmatprep.subr.bf16.mxu0 %v1637_v7  ;;  %v1789_v28 = vld [vmem:[%s1725_s25 + $0x20] sm:$0xff]  ;;  %v1792_v29 = vld [vmem:[%s1725_s25 + $0x30] sm:$0xff]  ;;  %v394_v32 = vpack.c.bf16 %v1783_v26, %v1780_v25  ;;  %v1647_v17 = vld [vmem:[%s1999_s1 + $0x88] sm:$0xff]  }
  0x18   : > { %1509 = vmatprep.subr.bf16.mxu1 %v1636_v12  ;;  %1511 = vmatprep.mubr.msk.bf16.mxu1 %vm218_vm0, %v179_v22  ;;  %v1796_v30 = vld [vmem:[%s1725_s25 + $0x40] sm:$0xff]  ;;  %v1799_v31 = vld [vmem:[%s1725_s25 + $0x50] sm:$0xff]  ;;  %v180_v35 = vpack.c.bf16 %v1792_v29, %v1789_v28  ;;  %v1646_v22 = vld [vmem:[%s1999_s1 + $0x78] sm:$0xff]  }
  0x19   : > { %1523 = vmatprep.mubr.msk.bf16.mxu0 %vm218_vm0, %v393_v23  ;;  %v1805_v33 = vld [vmem:[%s1725_s25 + $0x41] sm:$0xff]  ;;  %v1808_v34 = vld [vmem:[%s1725_s25 + $0x51] sm:$0xff]  ;;  %v181_v36 = vpack.c.bf16 %v1799_v31, %v1796_v30 }
  0x1a   : > { %1522 = vmatpush3.bf16.msra.mxu0 %v1637_v7  ;;  %v395_v37 = vpack.c.bf16 %v1808_v34, %v1805_v33  ;;  %v1821_v39 = vld [vmem:[%s1725_s25 + $0x60] sm:$0xff]  ;;  %v1824_v40 = vld [vmem:[%s1725_s25 + $0x70] sm:$0xff] }
  0x1b   : > { %1510 = vmatpush3.bf16.msra.mxu1 %v1636_v12  ;;  %1543 = vmatprep.subr.bf16.mxu0 %v1639_v27  ;;  %v1827_v41 = vld [vmem:[%s1725_s25 + $0x61] sm:$0xff]  ;;  %v1834_v43 = vld [vmem:[%s1725_s25 + $0x71] sm:$0xff]  ;;  %v182_v51 = vpack.c.bf16 %v1824_v40, %v1821_v39 }
  0x1c   : > { %1531 = vmatprep.subr.bf16.mxu1 %v1638_v24  ;;  %v1349_v44 = vld [vmem:[%s1725_s25 + $0x1b0] sm:$0xff]  ;;  %v1350_v45 = vld [vmem:[%s1725_s25 + $0x1c0] sm:$0xff]  ;;  %v396_v50 = vpack.c.bf16 %v1834_v43, %v1827_v41 }
  0x1d   : > { %1524 = vmatmul.mubr.msk.bf16.vlgmr.msra.gmra.mxu0 %vm218_vm0, %v394_v32  ;;  %v1331_v47 = vld [vmem:[%s1725_s25 + $0x120] sm:$0xff]  ;;  %v1332_v48 = vld [vmem:[%s1725_s25 + $0x130] sm:$0xff]  ;;  %v625_v52 = vpack.c.bf16 %v1350_v45, %v1349_v44  ;;  %v858_v44 = vpack.c.bf16 %v1821_v39, %v1799_v31 }
  0x1e   : > { %1512 = vmatmul.mubr.msk.bf16.vlgmr.msra.gmra.mxu1 %vm218_vm0, %v180_v35  ;;  %1544 = vmatpush3.bf16.msra.mxu0 %v1639_v27  ;;  %v509_v53 = vpack.c.bf16 %v1332_v48, %v1331_v47  ;;  %v1333_v54 = vld [vmem:[%s1725_s25 + $0x140] sm:$0xff]  ;;  %v1351_v55 = vld [vmem:[%s1725_s25 + $0x1d0] sm:$0xff]  ;;  %v856_v27 = vpack.c.bf16 %v1789_v28, %v1765_v19  ;;  %v857_v19 = vpack.c.bf16 %v1796_v30, %v1792_v29 }
  0x1f   : > { %1532 = vmatpush3.bf16.msra.mxu1 %v1638_v24  ;;  %1515 = vmatprep.mubr.msk.bf16.mxu1 %vm218_vm0, %v181_v36  ;;  %v1352_v56 = vld [vmem:[%s1725_s25 + $0x1e0] sm:$0xff]  ;;  %v1334_v57 = vld [vmem:[%s1725_s25 + $0x150] sm:$0xff]  ;;  %v1086_v48 = vpack.c.bf16 %v1780_v25, %v1769_v21  ;;  %v1088_v21 = vpack.c.bf16 %v1827_v41, %v1808_v34 }
  0x20   : > { %1527 = vmatprep.mubr.msk.bf16.mxu0 %vm218_vm0, %v395_v37  ;;  %1533 = vmatprep.subr.bf16.mxu1 %v1640_v38  ;;  %v1335_v58 = vld [vmem:[%s1725_s25 + $0x160] sm:$0xff]  ;;  %v1336_v59 = vld [vmem:[%s1725_s25 + $0x170] sm:$0xff]  ;;  %v626_v60 = vpack.c.bf16 %v1352_v56, %v1351_v55  ;;  %v510_v63 = vpack.c.bf16 %v1334_v57, %v1333_v54 }
  0x21   : > { %1545 = vmatprep.subr.bf16.mxu0 %v1641_v42  ;;  %v1353_v61 = vld [vmem:[%s1725_s25 + $0x1f0] sm:$0xff]  ;;  %v1354_v62 = vld [vmem:[%s1725_s25 + $0x200] sm:$0xff]  ;;  %v511_v0 = vpack.c.bf16 %v1336_v59, %v1335_v58 }
  0x22   : > { %1546 = vmatpush3.bf16.msra.mxu0 %v1641_v42  ;;  %v1865_v1 = vld [vmem:[%s1725_s25 + $0x110] sm:$0xff]  ;;  %v627_v2 = vpack.c.bf16 %v1354_v62, %v1353_v61  ;;  %v1645_v7 = vld [vmem:[%s1999_s1 + $0x60] sm:$0xff]  }
  0x23   : > { %1534 = vmatpush3.bf16.msra.mxu1 %v1640_v38  ;;  %1567 = vmatprep.subr.bf16.mxu0 %v1643_v46  ;;  %v1644_v3 = vld [vmem:[%s1999_s1 + $0x50] sm:$0xff]   ;;  %v975_v4 = vpack.c.bf16 %v1865_v1, %v1758_v16  ;;  %v1356_v12 = vld [vmem:[%s1725_s25 + $0x220] sm:$0xff] }
  0x24   : > { %1555 = vmatprep.subr.bf16.mxu1 %v1642_v49  ;;  %v1355_v8 = vld [vmem:[%s1725_s25 + $0x210] sm:$0xff]  ;;  %v1337_v13 = vld [vmem:[%s1725_s25 + $0x180] sm:$0xff] }
  0x25   : > { %1528 = vmatmul.mubr.msk.bf16.gmra.mxu0 %vm218_vm0, %v396_v50  ;;  %v1338_v14 = vld [vmem:[%s1725_s25 + $0x190] sm:$0xff]  ;;  %v1367_v18 = vld [vmem:[%s1725_s25 + $0x121] sm:$0xff]  ;;  %v628_v23 = vpack.c.bf16 %v1356_v12, %v1355_v8  ;;  %v973_v50 = vpack.c.bf16 %v1732_v6, %v1745_v11 }
  0x26   : > { %1516 = vmatmul.mubr.msk.bf16.gmra.mxu1 %vm218_vm0, %v182_v51  ;;  %1547 = vmatprep.mubr.msk.bf16.mxu0 %vm218_vm0, %v625_v52  ;;  %v1368_v20 = vld [vmem:[%s1725_s25 + $0x131] sm:$0xff]  ;;  %v512_v24 = vpack.c.bf16 %v1338_v14, %v1337_v13  ;;  %v1369_v35 = vld [vmem:[%s1725_s25 + $0x141] sm:$0xff] }
  0x27   : > { %1535 = vmatprep.mubr.msk.bf16.mxu1 %vm218_vm0, %v509_v53  ;;  %v739_v32 = vpack.c.bf16 %v1368_v20, %v1367_v18  ;;  %v1370_v36 = vld [vmem:[%s1725_s25 + $0x151] sm:$0xff]  ;;  %v1371_v37 = vld [vmem:[%s1725_s25 + $0x161] sm:$0xff] }
  0x28   : > { %v1372_v38 = vld [vmem:[%s1725_s25 + $0x171] sm:$0xff]  ;;  %v740_v28 = vpack.c.bf16 %v1370_v36, %v1369_v35  ;;  %v1392_v47 = vld [vmem:[%s1725_s25 + $0x80] sm:$0xff] }
  0x29   : > { %v741_v42 = vpack.c.bf16 %v1372_v38, %v1371_v37  ;;  %v1648_v45 = vld [vmem:[%s1999_s1 + $0x70] sm:$0xff]   ;;  %v1373_v29 = vld [vmem:[%s1725_s25 + $0x181] sm:$0xff]  ;;  %v859_v31 = vpack.c.bf16 %v1392_v47, %v1824_v40  ;;  %v1087_v40 = vpack.c.bf16 %v1805_v33, %v1783_v26 }
  0x2a   : > { %v1374_v30 = vld [vmem:[%s1725_s25 + $0x191] sm:$0xff] }
  0x2b   : > { %v742_v39 = vpack.c.bf16 %v1374_v30, %v1373_v29 }
  0x2d   : > { %1548 = vmatmul.mubr.msk.bf16.vlgmr.msra.gmra.mxu0 %vm218_vm0, %v626_v60 }
  0x2e   : > { %1536 = vmatmul.mubr.msk.bf16.vlgmr.msra.gmra.mxu1 %vm218_vm0, %v510_v63  ;;  %1568 = vmatpush3.bf16.msra.mxu0 %v1643_v46  ;;  %v1649_v46 = vld [vmem:[%s1999_s1 + $0x80] sm:$0xff]  }
  0x2f   : > { %1556 = vmatpush3.bf16.msra.mxu1 %v1642_v49  ;;  %1539 = vmatprep.mubr.msk.bf16.mxu1 %vm218_vm0, %v511_v0  ;;  %v972_v49 = vpack.c.bf16 %v1742_v10, %v1729_v5  ;;  %v974_v5 = vpack.c.bf16 %v1755_v15, %v1739_v9  ;;  %v1428_v10 = vld [vmem:[%s1725_s25 + $0x81] sm:$0xff]  ;;  %s1295_s25 = sshll.u32 %s1664_s9, 3 }
  0x30   : > { %1551 = vmatprep.mubr.msk.bf16.mxu0 %vm218_vm0, %v627_v2  ;;  %1557 = vmatprep.subr.bf16.mxu1 %v1644_v3  ;;  %v1089_v25 = vpack.c.bf16 %v1428_v10, %v1834_v43  ;;  %p1957_p5 = scmp.lt.s32.totalorder %s1295_s25, 15 }
  0x31   : > { %1569 = vmatprep.subr.bf16.mxu0 %v1645_v7 }
  0x32   : > { %1570 = vmatpush3.bf16.msra.mxu0 %v1645_v7  ;;  %s2009_s25 = smov (!%p1957_p5, %s1295_s25), 15 }
  0x33   : > { %1558 = vmatpush3.bf16.msra.mxu1 %v1644_v3  ;;  %1591 = vmatprep.subr.bf16.mxu0 %v1647_v17  ;;  %s1296_s9 = sshll.u32 %s2009_s25, 3 }
  0x34   : > { %1579 = vmatprep.subr.bf16.mxu1 %v1646_v22  ;;  %s1969_s6 = scalar_lea.vmem %s2000_s2, %s1296_s9 }
  0x35   : > { %1552 = vmatmul.mubr.msk.bf16.gmra.mxu0 %vm218_vm0, %v628_v23 }
  0x36   : > { %1540 = vmatmul.mubr.msk.bf16.gmra.mxu1 %vm218_vm0, %v512_v24  ;;  %1571 = vmatprep.mubr.msk.bf16.mxu0 %vm218_vm0, %v856_v27 }
  0x37   : > { %1559 = vmatprep.mubr.msk.bf16.mxu1 %vm218_vm0, %v739_v32 }
  0x3d   : > { %1572 = vmatmul.mubr.msk.bf16.vlgmr.msra.gmra.mxu0 %vm218_vm0, %v857_v19 }
  0x3e   : > { %1560 = vmatmul.mubr.msk.bf16.vlgmr.msra.gmra.mxu1 %vm218_vm0, %v740_v28  ;;  %1592 = vmatpush3.bf16.msra.mxu0 %v1647_v17 }
  0x3f   : > { %1580 = vmatpush3.bf16.msra.mxu1 %v1646_v22  ;;  %1563 = vmatprep.mubr.msk.bf16.mxu1 %vm218_vm0, %v741_v42 }
  0x40   : > { %1575 = vmatprep.mubr.msk.bf16.mxu0 %vm218_vm0, %v858_v44  ;;  %1581 = vmatprep.subr.bf16.mxu1 %v1648_v45 }
  0x41   : > { %1593 = vmatprep.subr.bf16.mxu0 %v1649_v46 }
  0x42   : > { %1594 = vmatpush3.bf16.msra.mxu0 %v1649_v46 }
  0x43   : > { %1582 = vmatpush3.bf16.msra.mxu1 %v1648_v45 }
  0x45   : > { %1576 = vmatmul.mubr.msk.bf16.gmra.mxu0 %vm218_vm0, %v859_v31 }
  0x46   : > { %1564 = vmatmul.mubr.msk.bf16.gmra.mxu1 %vm218_vm0, %v742_v39  ;;  %1595 = vmatprep.mubr.msk.bf16.mxu0 %vm218_vm0, %v1086_v48 }
  0x47   : > { %1583 = vmatprep.mubr.msk.bf16.mxu1 %vm218_vm0, %v972_v49 }
  0x4d   : > { %1596 = vmatmul.mubr.msk.bf16.vlgmr.msra.gmra.mxu0 %vm218_vm0, %v1087_v40 }
  0x4e   : > { %1584 = vmatmul.mubr.msk.bf16.vlgmr.msra.gmra.mxu1 %vm218_vm0, %v973_v50  ;;  %1599 = vmatprep.mubr.msk.bf16.mxu0 %vm218_vm0, %v1088_v21 }
  0x4f   : > { %1587 = vmatprep.mubr.msk.bf16.mxu1 %vm218_vm0, %v974_v5 }
  0x55   : > { %1600 = vmatmul.mubr.msk.bf16.gmra.mxu0 %vm218_vm0, %v1089_v25 }
  0x56   : > { %1588 = vmatmul.mubr.msk.bf16.gmra.mxu1 %vm218_vm0, %v975_v4 }
  0xd5   : > { %v1501_v6 = vpop.f32.mrf.mxu0 }
  0xd6   : > { %v1505_v9 = vpop.f32.mrf.mxu1 }
  0xd7   : > { %v265_v11 = vpop.f32.mrf.mxu0 }
  0xd8   : > { %v281_v15 = vpop.f32.mrf.mxu1 }
  0xd9   : > { %v1502_v26 = vpop.f32.mrf.mxu0 }
  0xda   : > { %v1506_v33 = vpop.f32.mrf.mxu1 }
  0xdb   : > { %v268_v34 = vpop.f32.mrf.mxu0 }
  0xdc   : > { %v1946_v41 = vpop.f32.mrf.mxu1 }
  0xdd   : > { %v1525_v51 = vpop.f32.mrf.mxu0 }
  0xde   : > { %v1513_v52 = vpop.f32.mrf.mxu1 }
  0xdf   : > { %v460_v53 = vpop.f32.mrf.mxu0  ;;  %v363_v32 = vadd.f32 %v1513_v52, %v1501_v6 }
  0xe0   : > { %v354_v43 = vpop.f32.mrf.mxu1 }
  0xe1   : > { %v1526_v54 = vpop.f32.mrf.mxu0  ;;  %v355_v37 = vadd.f32 %v354_v43, %v265_v11  ;;  %v493_v28 = vadd.f32 %v1525_v51, %v363_v32 }
  0xe2   : > { %v1514_v55 = vpop.f32.mrf.mxu1 }
  0xe3   : > { %v463_v56 = vpop.f32.mrf.mxu0  ;;  %v366_v42 = vadd.f32 %v1514_v55, %v1502_v26  ;;  %v491_v46 = vadd.f32 %v460_v53, %v355_v37 }
  0xe4   : > { %v357_v57 = vpop.f32.mrf.mxu1 }
  0xe5   : > { %v1529_v16 = vpop.f32.mrf.mxu0  ;;  %v358_v47 = vadd.f32 %v357_v57, %v268_v34  ;;  %v494_v39 = vadd.f32 %v1526_v54, %v366_v42 }
  0xe6   : > { %v1517_v58 = vpop.f32.mrf.mxu1 }
  0xe7   : > { %v476_v59 = vpop.f32.mrf.mxu0  ;;  %v379_v48 = vadd.f32 %v1517_v58, %v1505_v9  ;;  %v492_v5 = vadd.f32 %v463_v56, %v358_v47 }
  0xe8   : > { %v370_v60 = vpop.f32.mrf.mxu1 }
  0xe9   : > { %v1530_v61 = vpop.f32.mrf.mxu0  ;;  %v371_v50 = vadd.f32 %v370_v60, %v281_v15  ;;  %v497_v34 = vadd.f32 %v1529_v16, %v379_v48 }
  0xea   : > { %v1518_v62 = vpop.f32.mrf.mxu1 }
  0xeb   : > { %v1948_v63 = vpop.f32.mrf.mxu0  ;;  %v382_v11 = vadd.f32 %v1518_v62, %v1506_v33  ;;  %v495_v43 = vadd.f32 %v476_v59, %v371_v50 }
  0xec   : > { %v373_v0 = vpop.f32.mrf.mxu1 }
  0xed   : > { %v1549_v1 = vpop.f32.mrf.mxu0  ;;  %v374_v54 = vadd.f32 %v373_v0, %v1946_v41  ;;  %v498_v60 = vadd.f32 %v1530_v61, %v382_v11 }
  0xee   : > { %v1537_v2 = vpop.f32.mrf.mxu1 }
  0xef   : > { %v692_v3 = vpop.f32.mrf.mxu0  ;;  %v609_v29 = vadd.f32 %v1537_v2, %v493_v28 }
  0xf0   : > { %v576_v4 = vpop.f32.mrf.mxu1 }
  0xf1   : > { %v1550_v7 = vpop.f32.mrf.mxu0  ;;  %v607_v49 = vadd.f32 %v576_v4, %v491_v46  ;;  %v725_v10 = vadd.f32 %v1549_v1, %v609_v29  ;;  %v496_v4 = vadd.f32 %v1948_v63, %v374_v54 }
  0xf2   : > { %v1538_v8 = vpop.f32.mrf.mxu1 }
  0xf3   : > { %v695_v12 = vpop.f32.mrf.mxu0  ;;  %v610_v25 = vadd.f32 %v1538_v8, %v494_v39  ;;  %v723_v51 = vadd.f32 %v692_v3, %v607_v49 }
  0xf4   : > { %v579_v13 = vpop.f32.mrf.mxu1 }
  0xf5   : > { %v1553_v14 = vpop.f32.mrf.mxu0  ;;  %v608_v52 = vadd.f32 %v579_v13, %v492_v5  ;;  %v726_v57 = vadd.f32 %v1550_v7, %v610_v25 }
  0xf6   : > { %v1541_v17 = vpop.f32.mrf.mxu1 }
  0xf7   : > { %v1950_v18 = vpop.f32.mrf.mxu0  ;;  %v613_v15 = vadd.f32 %v1541_v17, %v497_v34  ;;  %v724_v33 = vadd.f32 %v695_v12, %v608_v52 }
  0xf8   : > { %v592_v20 = vpop.f32.mrf.mxu1 }
  0xf9   : > { %v1952_v22 = vpop.f32.mrf.mxu0  ;;  %v611_v1 = vadd.f32 %v592_v20, %v495_v43  ;;  %v729_v59 = vadd.f32 %v1553_v14, %v613_v15 }
  0xfa   : > { %v1542_v23 = vpop.f32.mrf.mxu1 }
  0xfb   : > { %v1954_v24 = vpop.f32.mrf.mxu0  ;;  %v614_v8 = vadd.f32 %v1542_v23, %v498_v60  ;;  %v727_v17 = vadd.f32 %v1950_v18, %v611_v1 }
  0xfc   : > { %v595_v27 = vpop.f32.mrf.mxu1 }
  0xfd   : > { %v1573_v35 = vpop.f32.mrf.mxu0 }
  0xfe   : > { %v1561_v36 = vpop.f32.mrf.mxu1 }
  0xff   : > { %v923_v38 = vpop.f32.mrf.mxu0  ;;  %v839_v53 = vadd.f32 %v1561_v36, %v725_v10  ;;  %v612_v36 = vadd.f32 %v595_v27, %v496_v4 }
 0x100   : > { %v806_v19 = vpop.f32.mrf.mxu1 }
 0x101   : > { %v1574_v44 = vpop.f32.mrf.mxu0  ;;  %v837_v58 = vadd.f32 %v806_v19, %v723_v51  ;;  %v956_v62 = vadd.f32 %v1573_v35, %v839_v53  ;;  %v730_v35 = vadd.f32 %v1952_v22, %v614_v8  ;;  %v728_v42 = vadd.f32 %v1954_v24, %v612_v36 }
 0x102   : > { %v1562_v45 = vpop.f32.mrf.mxu1 }
 0x103   : > { %v926_v30 = vpop.f32.mrf.mxu0  ;;  %v840_v16 = vadd.f32 %v1562_v45, %v726_v57  ;;  %v954_v32 = vadd.f32 %v923_v38, %v837_v58 }
 0x104   : > { %v809_v31 = vpop.f32.mrf.mxu1 }
 0x105   : > { %v1577_v40 = vpop.f32.mrf.mxu0  ;;  %v838_v41 = vadd.f32 %v809_v31, %v724_v33  ;;  %v957_v12 = vadd.f32 %v1574_v44, %v840_v16 }
 0x106   : > { %v1565_v21 = vpop.f32.mrf.mxu1 }
 0x107   : > { %v939_v6 = vpop.f32.mrf.mxu0  ;;  %v843_v63 = vadd.f32 %v1565_v21, %v729_v59  ;;  %v955_v38 = vadd.f32 %v926_v30, %v838_v41 }
 0x108   : > { %v822_v26 = vpop.f32.mrf.mxu1 }
 0x109   : > { %v1578_v9 = vpop.f32.mrf.mxu0  ;;  %v841_v18 = vadd.f32 %v822_v26, %v727_v17  ;;  %v960_v44 = vadd.f32 %v1577_v40, %v843_v63 }
 0x10a   : > { %v1566_v55 = vpop.f32.mrf.mxu1 }
 0x10b   : > { %v942_v56 = vpop.f32.mrf.mxu0  ;;  %v844_v46 = vadd.f32 %v1566_v55, %v730_v35  ;;  %v958_v31 = vadd.f32 %v939_v6, %v841_v18 }
 0x10c   : > { %v825_v2 = vpop.f32.mrf.mxu1 }
 0x10d   : > { %v1597_v3 = vpop.f32.mrf.mxu0  ;;  %v842_v39 = vadd.f32 %v825_v2, %v728_v42  ;;  %v961_v21 = vadd.f32 %v1578_v9, %v844_v46 }
 0x10e   : > { %v1585_v13 = vpop.f32.mrf.mxu1 }
 0x10f   : > { %v1072_v0 = vadd.f32 %v1585_v13, %v956_v62  ;;  %v1153_v7 = vpop.f32.mrf.mxu0  ;;  %v959_v11 = vadd.f32 %v942_v56, %v842_v39 }
 0x110   : > { %v1039_v61 = vpop.f32.mrf.mxu1 }
 0x111   : > { %v1186_v20 = vadd.f32 %v1597_v3, %v1072_v0  ;;  %v1070_v14 = vadd.f32 %v1039_v61, %v954_v32  ;;  %v1598_v23 = vpop.f32.mrf.mxu0 }
 0x112   : > { %v1586_v37 = vpop.f32.mrf.mxu1 }
 0x113   : > { %1195 = vst.msk [vmem:[%s1969_s6 + $0x10] sm:$0xff] %vm1192_vm1, %v1186_v20  ;;  %v1184_v27 = vadd.f32 %v1153_v7, %v1070_v14  ;;  %v1073_v19 = vadd.f32 %v1586_v37, %v957_v12  ;;  %v1156_v28 = vpop.f32.mrf.mxu0 }
 0x114   : > { %v1042_v45 = vpop.f32.mrf.mxu1 }
 0x115   : > { %1193 = vst.msk [vmem:[%s1969_s6] sm:$0xff] %vm1192_vm1, %v1184_v27  ;;  %v1187_v47 = vadd.f32 %v1598_v23, %v1073_v19  ;;  %v1071_v29 = vadd.f32 %v1042_v45, %v955_v38  ;;  %v1601_v22 = vpop.f32.mrf.mxu0 }
 0x116   : > { %v1589_v30 = vpop.f32.mrf.mxu1 }
 0x117   : > { %1196 = vst.msk [vmem:[%s1969_s6 + $0x18] sm:$0xff] %vm1192_vm1, %v1187_v47  ;;  %v1185_v48 = vadd.f32 %v1156_v28, %v1071_v29  ;;  %v1076_v49 = vadd.f32 %v1589_v30, %v960_v44  ;;  %v1169_v50 = vpop.f32.mrf.mxu0 }
 0x118   : > { %v1055_v24 = vpop.f32.mrf.mxu1 }
 0x119   : > { %1194 = vst.msk [vmem:[%s1969_s6 + $0x8] sm:$0xff] %vm1192_vm1, %v1185_v48  ;;  %v1190_v40 = vadd.f32 %v1601_v22, %v1076_v49  ;;  %v1074_v5 = vadd.f32 %v1055_v24, %v958_v31  ;;  %v1602_v25 = vpop.f32.mrf.mxu0 }
 0x11a   : > { %v1590_v10 = vpop.f32.mrf.mxu1 }
 0x11b   : > { %1199 = vst.msk [vmem:[%s1969_s6 + $0x30] sm:$0xff] %vm1192_vm1, %v1190_v40  ;;  %v1188_v6 = vadd.f32 %v1169_v50, %v1074_v5  ;;  %v1077_v26 = vadd.f32 %v1590_v10, %v961_v21  ;;  %v1172_v53 = vpop.f32.mrf.mxu0 }
 0x11c   : > { %v1058_v34 = vpop.f32.mrf.mxu1 }
 0x11d   : > { %1197 = vst.msk [vmem:[%s1969_s6 + $0x20] sm:$0xff] %vm1192_vm1, %v1188_v6  ;;  %v1191_v51 = vadd.f32 %v1602_v25, %v1077_v26  ;;  %v1075_v52 = vadd.f32 %v1058_v34, %v959_v11 }
 0x11f   : > { %1200 = vst.msk [vmem:[%s1969_s6 + $0x38] sm:$0xff] %vm1192_vm1, %v1191_v51  ;;  %v1189_v9 = vadd.f32 %v1172_v53, %v1075_v52 }
 0x121   : > { %1198 = vst.msk [vmem:[%s1969_s6 + $0x28] sm:$0xff] %vm1192_vm1, %v1189_v9 }
 0x122 PF: > { %s12_s11 = sadd.s32 1, %s1672_s11   ;;  %s2002_s9 = smov %s1668_s10 }
 0x123   : > { %p9_p6 = scmp.ge.s32.totalorder %s12_s11, 4   ;;  %s2003_s10 = smov %s2005_s12 }
 0x125   :  { %11 = sbr.rel (!%p9_p6) target bundleno = 2 (0x2), region = 72 }

// kernel: fwd.17
= control target key start
LH: loop header
LB: loop body
LE: loop exit
PB: predicated region body
PF: predicated region fallthrough
CT: control target
= control target key end

     0   :  { %s148_s0 = inlined_call_operand.vmem [shape: f32[64,128], index: 0, kind: input, shape index: {}]   ;;  %s149_s1 = inlined_call_operand.vmem [shape: f32[1,128], index: 1, kind: input, shape index: {}]   ;;  %s150_s2 = inlined_call_operand.vmem [shape: f32[1,128], index: 2, kind: input, shape index: {}]   ;;  %s151_s3 = inlined_call_operand.vmem [shape: f32[64,128], index: 3, kind: output, shape index: {}]  }
   0x1   :  { %v14_v0 = vld [vmem:[%s148_s0] sm:$0xff]  ;;  %v15_v4 = vld [vmem:[%s148_s0 + $0x8] sm:$0xff]  ;;  %v16_v5 = vld [vmem:[%s148_s0 + $0x10] sm:$0xff] }
   0x2   :  { %v72_v1 = vld [vmem:[%s149_s1] ss:$0 sm:$0xff]  ;;  %v17_v6 = vld [vmem:[%s148_s0 + $0x18] sm:$0xff]  ;;  %v19_v11 = vld [vmem:[%s148_s0 + $0x28] sm:$0xff] }
   0x3   :  { %v73_v2 = vld [vmem:[%s150_s2] ss:$0 sm:$0xff]  ;;  %v29_v3 = vmul.f32 %v72_v1, %v14_v0  ;;  %v30_v7 = vmul.f32 %v72_v1, %v15_v4  ;;  %v31_v8 = vmul.f32 %v72_v1, %v16_v5  ;;  %v32_v9 = vmul.f32 %v72_v1, %v17_v6  ;;  %v20_v12 = vld [vmem:[%s148_s0 + $0x30] sm:$0xff]  ;;  %v21_v17 = vld [vmem:[%s148_s0 + $0x38] sm:$0xff] }
   0x4   :  { %v18_v10 = vld [vmem:[%s148_s0 + $0x20] sm:$0xff]  ;;  %v34_v15 = vmul.f32 %v72_v1, %v19_v11  ;;  %v35_v16 = vmul.f32 %v72_v1, %v20_v12  ;;  %v36_v21 = vmul.f32 %v72_v1, %v21_v17 }
   0x5   :  { %v44_v13 = vadd.f32 %v73_v2, %v29_v3  ;;  %v33_v14 = vmul.f32 %v72_v1, %v18_v10  ;;  %v45_v18 = vadd.f32 %v73_v2, %v30_v7  ;;  %v46_v19 = vadd.f32 %v73_v2, %v31_v8 }
   0x6   :  { %v47_v20 = vadd.f32 %v73_v2, %v32_v9  ;;  %v49_v24 = vadd.f32 %v73_v2, %v34_v15  ;;  %v50_v25 = vadd.f32 %v73_v2, %v35_v16  ;;  %v51_v29 = vadd.f32 %v73_v2, %v36_v21 }
   0x7   :  { %v52_v22 = vmax.f32 %v44_v13, 0.0  ;;  %v48_v23 = vadd.f32 %v73_v2, %v33_v14  ;;  %v53_v26 = vmax.f32 %v45_v18, 0.0  ;;  %v54_v27 = vmax.f32 %v46_v19, 0.0 }
   0x8   :  { %v55_v28 = vmax.f32 %v47_v20, 0.0  ;;  %v57_v31 = vmax.f32 %v49_v24, 0.0  ;;  %v58_v32 = vmax.f32 %v50_v25, 0.0  ;;  %v59_v33 = vmax.f32 %v51_v29, 0.0 }
   0x9   :  { %60 = vst [vmem:[%s151_s3] sm:$0xff] %v52_v22  ;;  %v56_v30 = vmax.f32 %v48_v23, 0.0  ;;  %61 = vst [vmem:[%s151_s3 + $0x8] sm:$0xff] %v53_v26 }
   0xa   :  { %62 = vst [vmem:[%s151_s3 + $0x10] sm:$0xff] %v54_v27  ;;  %63 = vst [vmem:[%s151_s3 + $0x18] sm:$0xff] %v55_v28 }
   0xb   :  { %64 = vst [vmem:[%s151_s3 + $0x20] sm:$0xff] %v56_v30  ;;  %65 = vst [vmem:[%s151_s3 + $0x28] sm:$0xff] %v57_v31 }
   0xc   :  { %66 = vst [vmem:[%s151_s3 + $0x30] sm:$0xff] %v58_v32  ;;  %67 = vst [vmem:[%s151_s3 + $0x38] sm:$0xff] %v59_v33 }

// kernel: fwd.19
= control target key start
LH: loop header
LB: loop body
LE: loop exit
PB: predicated region body
PF: predicated region fallthrough
CT: control target
= control target key end

     0   :  { %s456_s9 = smov 0   ;;  %s458_s10 = smov 0   ;;  %s512_s0 = inlined_call_operand.vmem [shape: f32[2,8,8,32], index: 0, kind: input, shape index: {}]   ;;  %s513_s1 = inlined_call_operand.vmem [shape: bf16[1,32,64], index: 1, kind: input, shape index: {}]   ;;  %s514_s2 = inlined_call_operand.vmem [shape: f32[128,64], index: 2, kind: output, shape index: {}]  }
   0x1   :  { %s460_s11 = smov 0  }
   0x2 LB: > { %s24_s12 = sadd.s32 1, %s435_s10  ;;  %p355_p0 = scmp.ge.s32.totalorder %s439_s11, 1  ;;  %s439_s11 = sphi %s460_s11, %s12_s11   ;;  %s435_s10 = sphi %s458_s10, %s516_s10   ;;  %s431_s9 = sphi %s456_s9, %s515_s9  }
   0x3   : > { %p26_p1 = scmp.ge.s32.totalorder %s24_s12, 2  ;;  %p126_p2 = scmp.lt.s32.totalorder %s439_s11, 3 }
   0x5   : > { %s518_s12 = smov (%p26_p1, %s24_s12), 0  ;;  %p127_p3 = pnand %p355_p0, %p126_p2 }
   0x6   : > { %p149_p4 = scmp.lt.s32.totalorder (!%p127_p3), %s431_s9, 1  ;;  %s358_s22 = sshll.u32 (!%p127_p3), %s431_s9, 3 }
   0x7   : > { %130 = sbr.rel (%p127_p3) target bundleno = 221 (0xdd), region = 28  ;;  %p156_p5 = scmp.lt.s32.totalorder (!%p127_p3), %s358_s22, 15 }
   0xc   : > { %v415_v0 = vld [vmem:[%s513_s1 + $0x8] sm:$0xff]   ;;  %v416_v1 = vld [vmem:[%s513_s1] sm:$0xff]   ;;  %s150_s17 = scalar_select %p149_p4, %s431_s9, 1  ;;  %vm194_vm0 = vcmask 261120   ;;  %vm272_vm1 = vcmask 523264  }
   0xd   : > { %375 = vmatprep.subr.bf16.mxu0 %v415_v0  ;;  %387 = vmatprep.subr.bf16.mxu1 %v415_v0  ;;  %s520_s22 = smov (!%p156_p5, %s358_s22), 15 }
   0xe   : > { %376 = vmatpush3.bf16.msra.mxu0 %v415_v0  ;;  %389 = vmatpush3.bf16.msra.mxu1 %v415_v0  ;;  %s368_s18 = sshll.u32 %s150_s17, 6  ;;  %s359_s23 = sshll.u32 %s520_s22, 3 }
   0xf   : > { %377 = vmatprep.subr.bf16.mxu0 %v416_v1  ;;  %388 = vmatprep.subr.bf16.mxu1 %v416_v1  ;;  %s153_s21 = scalar_lea.vmem %s512_s0, %s368_s18  ;;  %s159_s26 = scalar_lea.vmem %s514_s2, %s359_s23 }
  0x10   : > { %v166_v2 = vld [vmem:[%s153_s21] sm:$0xff]  ;;  %v167_v3 = vld [vmem:[%s153_s21 + $0x8] sm:$0xff]  ;;  %v168_v7 = vld [vmem:[%s153_s21 + $0x10] sm:$0xff] }
  0x11   : > { %v170_v4 = vld [vmem:[%s153_s21 + $0x20] sm:$0xff]  ;;  %v174_v5 = vpack.c.bf16 %v167_v3, %v166_v2  ;;  %v171_v6 = vld [vmem:[%s153_s21 + $0x28] sm:$0xff]  ;;  %v169_v8 = vld [vmem:[%s153_s21 + $0x18] sm:$0xff] }
  0x12   : > { %378 = vmatpush3.bf16.msra.mxu0 %v416_v1  ;;  %390 = vmatpush3.bf16.msra.mxu1 %v416_v1  ;;  %v176_v9 = vpack.c.bf16 %v171_v6, %v170_v4  ;;  %v175_v10 = vpack.c.bf16 %v169_v8, %v168_v7  ;;  %v172_v11 = vld [vmem:[%s153_s21 + $0x30] sm:$0xff]  ;;  %v173_v12 = vld [vmem:[%s153_s21 + $0x38] sm:$0xff] }
  0x13   : > { %379 = vmatprep.mubr.msk.bf16.mxu0 %vm194_vm0, %v174_v5  ;;  %v177_v13 = vpack.c.bf16 %v173_v12, %v172_v11 }
  0x14   : > { %383 = vmatprep.mubr.msk.bf16.mxu1 %vm194_vm0, %v176_v9 }
  0x15   : > { %380 = vmatmul.mubr.msk.bf16.vlgmr.msra.gmra.mxu0 %vm194_vm0, %v175_v10  ;;  %384 = vmatmul.mubr.msk.bf16.vlgmr.msra.gmra.mxu1 %vm194_vm0, %v177_v13 }
  0xd5   : > { %v381_v14 = vpop.f32.mrf.mxu0  ;;  %v385_v15 = vpop.f32.mrf.mxu1 }
  0xd6   : > { %275 = vst.msk [vmem:[%s159_s26 + $0x10] sm:$0xff] %vm272_vm1, %v381_v14  ;;  %279 = vst.msk [vmem:[%s159_s26 + $0x30] sm:$0xff] %vm272_vm1, %v385_v15 }
  0xd7   : > { %v241_v16 = vpop.f32.mrf.mxu0  ;;  %v257_v17 = vpop.f32.mrf.mxu1 }
  0xd8   : > { %273 = vst.msk [vmem:[%s159_s26] sm:$0xff] %vm272_vm1, %v241_v16  ;;  %277 = vst.msk [vmem:[%s159_s26 + $0x20] sm:$0xff] %vm272_vm1, %v257_v17 }
  0xd9   : > { %v382_v18 = vpop.f32.mrf.mxu0  ;;  %v386_v19 = vpop.f32.mrf.mxu1 }
  0xda   : > { %276 = vst.msk [vmem:[%s159_s26 + $0x18] sm:$0xff] %vm272_vm1, %v382_v18  ;;  %280 = vst.msk [vmem:[%s159_s26 + $0x38] sm:$0xff] %vm272_vm1, %v386_v19 }
  0xdb   : > { %v244_v20 = vpop.f32.mrf.mxu0  ;;  %v260_v21 = vpop.f32.mrf.mxu1 }
  0xdc   : > { %274 = vst.msk [vmem:[%s159_s26 + $0x8] sm:$0xff] %vm272_vm1, %v244_v20  ;;  %278 = vst.msk [vmem:[%s159_s26 + $0x28] sm:$0xff] %vm272_vm1, %v260_v21 }
  0xdd PF: > { %s12_s11 = sadd.s32 1, %s439_s11   ;;  %s515_s9 = smov %s435_s10 }
  0xde   : > { %p9_p6 = scmp.ge.s32.totalorder %s12_s11, 4   ;;  %s516_s10 = smov %s518_s12 }
  0xe0   :  { %11 = sbr.rel (!%p9_p6) target bundleno = 2 (0x2), region = 59 }

// kernel: fwd.21
= control target key start
LH: loop header
LB: loop body
LE: loop exit
PB: predicated region body
PF: predicated region fallthrough
CT: control target
= control target key end

     0   :  { %s140_s0 = inlined_call_operand.vmem [shape: f32[64,128], index: 0, kind: input, shape index: {}]   ;;  %s141_s1 = inlined_call_operand.vmem [shape: f32[1,128], index: 1, kind: input, shape index: {}]   ;;  %s142_s2 = inlined_call_operand.vmem [shape: f32[1,128], index: 2, kind: input, shape index: {}]   ;;  %s143_s3 = inlined_call_operand.vmem [shape: f32[64,128], index: 3, kind: output, shape index: {}]  }
   0x1   :  { %v14_v0 = vld [vmem:[%s140_s0] sm:$0xff]  ;;  %v15_v4 = vld [vmem:[%s140_s0 + $0x8] sm:$0xff]  ;;  %v16_v5 = vld [vmem:[%s140_s0 + $0x10] sm:$0xff] }
   0x2   :  { %v64_v1 = vld [vmem:[%s141_s1] ss:$0 sm:$0xff]  ;;  %v17_v6 = vld [vmem:[%s140_s0 + $0x18] sm:$0xff]  ;;  %v19_v11 = vld [vmem:[%s140_s0 + $0x28] sm:$0xff] }
   0x3   :  { %v65_v2 = vld [vmem:[%s142_s2] ss:$0 sm:$0xff]  ;;  %v29_v3 = vmul.f32 %v64_v1, %v14_v0  ;;  %v30_v7 = vmul.f32 %v64_v1, %v15_v4  ;;  %v31_v8 = vmul.f32 %v64_v1, %v16_v5  ;;  %v32_v9 = vmul.f32 %v64_v1, %v17_v6  ;;  %v20_v12 = vld [vmem:[%s140_s0 + $0x30] sm:$0xff]  ;;  %v21_v17 = vld [vmem:[%s140_s0 + $0x38] sm:$0xff] }
   0x4   :  { %v18_v10 = vld [vmem:[%s140_s0 + $0x20] sm:$0xff]  ;;  %v34_v15 = vmul.f32 %v64_v1, %v19_v11  ;;  %v35_v16 = vmul.f32 %v64_v1, %v20_v12  ;;  %v36_v21 = vmul.f32 %v64_v1, %v21_v17 }
   0x5   :  { %v44_v13 = vadd.f32 %v65_v2, %v29_v3  ;;  %v33_v14 = vmul.f32 %v64_v1, %v18_v10  ;;  %v45_v18 = vadd.f32 %v65_v2, %v30_v7  ;;  %v46_v19 = vadd.f32 %v65_v2, %v31_v8 }
   0x6   :  { %v47_v20 = vadd.f32 %v65_v2, %v32_v9  ;;  %v49_v23 = vadd.f32 %v65_v2, %v34_v15  ;;  %v50_v24 = vadd.f32 %v65_v2, %v35_v16  ;;  %v51_v25 = vadd.f32 %v65_v2, %v36_v21 }
   0x7   :  { %52 = vst [vmem:[%s143_s3] sm:$0xff] %v44_v13  ;;  %v48_v22 = vadd.f32 %v65_v2, %v33_v14  ;;  %53 = vst [vmem:[%s143_s3 + $0x8] sm:$0xff] %v45_v18 }
   0x8   :  { %54 = vst [vmem:[%s143_s3 + $0x10] sm:$0xff] %v46_v19  ;;  %55 = vst [vmem:[%s143_s3 + $0x18] sm:$0xff] %v47_v20 }
   0x9   :  { %56 = vst [vmem:[%s143_s3 + $0x20] sm:$0xff] %v48_v22  ;;  %57 = vst [vmem:[%s143_s3 + $0x28] sm:$0xff] %v49_v23 }
   0xa   :  { %58 = vst [vmem:[%s143_s3 + $0x30] sm:$0xff] %v50_v24  ;;  %59 = vst [vmem:[%s143_s3 + $0x38] sm:$0xff] %v51_v25 }

// kernel: fwd.23
= control target key start
LH: loop header
LB: loop body
LE: loop exit
PB: predicated region body
PF: predicated region fallthrough
CT: control target
= control target key end

     0   :  { %s196_s0 = inlined_call_operand.vmem [shape: f32[64,128], index: 0, kind: input, shape index: {}]   ;;  %s197_s1 = inlined_call_operand.vmem [shape: f32[64,128], index: 1, kind: input, shape index: {}]   ;;  %s198_s2 = inlined_call_operand.vmem [shape: f32[1,128], index: 2, kind: input, shape index: {}]   ;;  %s199_s3 = inlined_call_operand.vmem [shape: f32[1,128], index: 3, kind: input, shape index: {}]   ;;  %s200_s4 = inlined_call_operand.vmem [shape: f32[64,128], index: 4, kind: output, shape index: {}]  }
   0x1   :  { %v17_v0 = vld [vmem:[%s196_s0] sm:$0xff]  ;;  %v18_v4 = vld [vmem:[%s196_s0 + $0x8] sm:$0xff]  ;;  %v19_v7 = vld [vmem:[%s196_s0 + $0x10] sm:$0xff] }
   0x2   :  { %v91_v1 = vld [vmem:[%s198_s2] ss:$0 sm:$0xff]  ;;  %v20_v8 = vld [vmem:[%s196_s0 + $0x18] sm:$0xff]  ;;  %v56_v10 = vld [vmem:[%s197_s1 + $0x8] sm:$0xff] }
   0x3   :  { %v92_v2 = vld [vmem:[%s199_s3] ss:$0 sm:$0xff]  ;;  %v32_v3 = vmul.f32 %v91_v1, %v17_v0  ;;  %v33_v6 = vmul.f32 %v91_v1, %v18_v4  ;;  %v34_v11 = vmul.f32 %v91_v1, %v19_v7  ;;  %v57_v12 = vld [vmem:[%s197_s1 + $0x10] sm:$0xff]  ;;  %v35_v13 = vmul.f32 %v91_v1, %v20_v8  ;;  %v58_v16 = vld [vmem:[%s197_s1 + $0x18] sm:$0xff] }
   0x4   :  { %v55_v5 = vld [vmem:[%s197_s1] sm:$0xff]  ;;  %v22_v18 = vld [vmem:[%s196_s0 + $0x28] sm:$0xff]  ;;  %v23_v19 = vld [vmem:[%s196_s0 + $0x30] sm:$0xff] }
   0x5   :  { %v47_v9 = vadd.f32 %v92_v2, %v32_v3  ;;  %v21_v14 = vld [vmem:[%s196_s0 + $0x20] sm:$0xff]  ;;  %v48_v15 = vadd.f32 %v92_v2, %v33_v6  ;;  %v49_v21 = vadd.f32 %v92_v2, %v34_v11  ;;  %v50_v22 = vadd.f32 %v92_v2, %v35_v13  ;;  %v24_v25 = vld [vmem:[%s196_s0 + $0x38] sm:$0xff]  ;;  %v60_v28 = vld [vmem:[%s197_s1 + $0x28] sm:$0xff] }
   0x6   :  { %v36_v17 = vmul.f32 %v91_v1, %v21_v14  ;;  %v59_v23 = vld [vmem:[%s197_s1 + $0x20] sm:$0xff]  ;;  %v37_v24 = vmul.f32 %v91_v1, %v22_v18  ;;  %v38_v29 = vmul.f32 %v91_v1, %v23_v19  ;;  %v39_v30 = vmul.f32 %v91_v1, %v24_v25  ;;  %v61_v35 = vld [vmem:[%s197_s1 + $0x30] sm:$0xff]  ;;  %v62_v36 = vld [vmem:[%s197_s1 + $0x38] sm:$0xff] }
   0x7   :  { %v63_v20 = vadd.f32 %v55_v5, %v47_v9  ;;  %v64_v26 = vadd.f32 %v56_v10, %v48_v15  ;;  %v65_v32 = vadd.f32 %v57_v12, %v49_v21  ;;  %v66_v33 = vadd.f32 %v58_v16, %v50_v22 }
   0x8   :  { %v51_v27 = vadd.f32 %v92_v2, %v36_v17  ;;  %v52_v34 = vadd.f32 %v92_v2, %v37_v24  ;;  %v53_v39 = vadd.f32 %v92_v2, %v38_v29  ;;  %v54_v40 = vadd.f32 %v92_v2, %v39_v30 }
   0x9   :  { %v71_v31 = vmax.f32 %v63_v20, 0.0  ;;  %v72_v37 = vmax.f32 %v64_v26, 0.0  ;;  %v73_v41 = vmax.f32 %v65_v32, 0.0  ;;  %v74_v42 = vmax.f32 %v66_v33, 0.0 }
   0xa   :  { %v67_v38 = vadd.f32 %v59_v23, %v51_v27  ;;  %v68_v43 = vadd.f32 %v60_v28, %v52_v34  ;;  %v69_v45 = vadd.f32 %v61_v35, %v53_v39  ;;  %v70_v46 = vadd.f32 %v62_v36, %v54_v40 }
   0xb   :  { %79 = vst [vmem:[%s200_s4] sm:$0xff] %v71_v31  ;;  %80 = vst [vmem:[%s200_s4 + $0x8] sm:$0xff] %v72_v37 }
   0xc   :  { %v75_v44 = vmax.f32 %v67_v38, 0.0  ;;  %81 = vst [vmem:[%s200_s4 + $0x10] sm:$0xff] %v73_v41  ;;  %82 = vst [vmem:[%s200_s4 + $0x18] sm:$0xff] %v74_v42  ;;  %v76_v47 = vmax.f32 %v68_v43, 0.0  ;;  %v77_v48 = vmax.f32 %v69_v45, 0.0  ;;  %v78_v49 = vmax.f32 %v70_v46, 0.0 }
   0xe   :  { %83 = vst [vmem:[%s200_s4 + $0x20] sm:$0xff] %v75_v44  ;;  %84 = vst [vmem:[%s200_s4 + $0x28] sm:$0xff] %v76_v47 }
   0xf   :  { %85 = vst [vmem:[%s200_s4 + $0x30] sm:$0xff] %v77_v48  ;;  %86 = vst [vmem:[%s200_s4 + $0x38] sm:$0xff] %v78_v49 }

// kernel: fwd.18
= control target key start
LH: loop header
LB: loop body
LE: loop exit
PB: predicated region body
PF: predicated region fallthrough
CT: control target
= control target key end

     0   :  { %s1930_s9 = smov 0   ;;  %s1932_s10 = smov 0   ;;  %s2274_s0 = inlined_call_operand.vmem [shape: f32[2,10,10,64], index: 0, kind: input, shape index: {}]   ;;  %s2275_s1 = inlined_call_operand.vmem [shape: bf16[9,64,64], index: 1, kind: input, shape index: {}]   ;;  %s2276_s2 = inlined_call_operand.vmem [shape: f32[128,64], index: 2, kind: output, shape index: {}]  }
   0x1   :  { %s1934_s11 = smov 0  }
   0x2 LB: > { %s24_s12 = sadd.s32 1, %s1909_s10  ;;  %p1416_p0 = scmp.ge.s32.totalorder %s1913_s11, 1  ;;  %s1913_s11 = sphi %s1934_s11, %s12_s11   ;;  %s1909_s10 = sphi %s1932_s10, %s2279_s10   ;;  %s1905_s9 = sphi %s1930_s9, %s2278_s9  }
   0x3   : > { %p26_p1 = scmp.ge.s32.totalorder %s24_s12, 2  ;;  %p126_p2 = scmp.lt.s32.totalorder %s1913_s11, 3 }
   0x5   : > { %s2281_s12 = smov (%p26_p1, %s24_s12), 0  ;;  %p127_p3 = pnand %p1416_p0, %p126_p2 }
   0x6   : > { %p149_p4 = scmp.lt.s32.totalorder (!%p127_p3), %s1905_s9, 1 }
   0x7   : > { %130 = sbr.rel (%p127_p3) target bundleno = 296 (0x128), region = 28 }
   0xc   : > { %v1855_v0 = vld [vmem:[%s2275_s1 + $0x38] sm:$0xff]   ;;  %v1857_v2 = vld [vmem:[%s2275_s1 + $0x30] sm:$0xff]   ;;  %s150_s19 = scalar_select %p149_p4, %s1905_s9, 1  ;;  %v1859_v4 = vld [vmem:[%s2275_s1 + $0x28] sm:$0xff]   ;;  %vm231_vm0 = vcmask 523264  }
   0xd   : > { %v1856_v1 = vld [vmem:[%s2275_s1 + $0x18] sm:$0xff]   ;;  %1678 = vmatprep.subr.bf16.mxu0 %v1855_v0  ;;  %v1858_v3 = vld [vmem:[%s2275_s1 + $0x10] sm:$0xff]   ;;  %v1860_v5 = vld [vmem:[%s2275_s1 + $0x8] sm:$0xff]  }
   0xe   : > { %1694 = vmatprep.subr.bf16.mxu1 %v1856_v1  ;;  %1679 = vmatpush3.bf16.msra.mxu0 %v1855_v0  ;;  %s1830_s24 = smul.u32 160, %s150_s19  ;;  %v1861_v6 = vld [vmem:[%s2275_s1 + $0x20] sm:$0xff]   ;;  %v1863_v18 = vld [vmem:[%s2275_s1 + $0x58] sm:$0xff]   ;;  %v1865_v26 = vld [vmem:[%s2275_s1 + $0x50] sm:$0xff]  }
   0xf   : > { %1695 = vmatpush3.bf16.msra.mxu1 %v1856_v1  ;;  %1680 = vmatprep.subr.bf16.mxu0 %v1857_v2  ;;  %v1862_v10 = vld [vmem:[%s2275_s1] sm:$0xff]   ;;  %v1864_v19 = vld [vmem:[%s2275_s1 + $0x78] sm:$0xff]   ;;  %v1866_v27 = vld [vmem:[%s2275_s1 + $0x70] sm:$0xff]  }
  0x10   : > { %1696 = vmatprep.subr.bf16.mxu1 %v1858_v3  ;;  %s1973_s29 = scalar_lea.vmem %s2274_s0, %s1830_s24  ;;  %v1867_v34 = vld [vmem:[%s2275_s1 + $0x48] sm:$0xff]   ;;  %v1869_v40 = vld [vmem:[%s2275_s1 + $0x40] sm:$0xff]   ;;  %v1871_v46 = vld [vmem:[%s2275_s1 + $0x98] sm:$0xff]  }
  0x11   : > { %v186_v7 = vld [vmem:[%s1973_s29 + $0x1] sm:$0xff]  ;;  %v1980_v8 = vld [vmem:[%s1973_s29 + $0x11] sm:$0xff] }
  0x12   : > { %1681 = vmatpush3.bf16.msra.mxu0 %v1857_v2  ;;  %v166_v9 = vld [vmem:[%s1973_s29] sm:$0xff]  ;;  %v194_v11 = vpack.c.bf16 %v1980_v8, %v186_v7  ;;  %v1988_v12 = vld [vmem:[%s1973_s29 + $0x10] sm:$0xff]  ;;  %v1868_v35 = vld [vmem:[%s2275_s1 + $0x68] sm:$0xff]  }
  0x13   : > { %1697 = vmatpush3.bf16.msra.mxu1 %v1858_v3  ;;  %1682 = vmatprep.subr.bf16.mxu0 %v1859_v4  ;;  %v1991_v13 = vld [vmem:[%s1973_s29 + $0x21] sm:$0xff]  ;;  %v174_v14 = vpack.c.bf16 %v1988_v12, %v166_v9  ;;  %v1995_v15 = vld [vmem:[%s1973_s29 + $0x31] sm:$0xff] }
  0x14   : > { %1698 = vmatprep.subr.bf16.mxu1 %v1860_v5  ;;  %v1998_v16 = vld [vmem:[%s1973_s29 + $0x20] sm:$0xff]  ;;  %1686 = vmatprep.mubr.msk.bf16.mxu0 %vm231_vm0, %v194_v11  ;;  %v2002_v17 = vld [vmem:[%s1973_s29 + $0x30] sm:$0xff]  ;;  %v2013_v20 = vpack.c.bf16 %v1995_v15, %v1991_v13  ;;  %v1872_v47 = vld [vmem:[%s2275_s1 + $0xb8] sm:$0xff]   ;;  %v681_v1 = vpack.c.bf16 %v1991_v13, %v1980_v8 }
  0x15   : > { %1702 = vmatprep.mubr.msk.bf16.mxu1 %vm231_vm0, %v174_v14  ;;  %v2016_v21 = vld [vmem:[%s1973_s29 + $0x41] sm:$0xff]  ;;  %v2020_v22 = vpack.c.bf16 %v2002_v17, %v1998_v16  ;;  %v2023_v23 = vld [vmem:[%s1973_s29 + $0x51] sm:$0xff]  ;;  %v551_v43 = vpack.c.bf16 %v1998_v16, %v1988_v12 }
  0x16   : > { %1683 = vmatpush3.bf16.msra.mxu0 %v1859_v4  ;;  %v170_v24 = vld [vmem:[%s1973_s29 + $0x40] sm:$0xff]  ;;  %v2027_v25 = vld [vmem:[%s1973_s29 + $0x50] sm:$0xff]  ;;  %v2037_v28 = vpack.c.bf16 %v2023_v23, %v2016_v21  ;;  %v1875_v59 = vld [vmem:[%s2275_s1 + $0x88] sm:$0xff]  }
  0x17   : > { %1699 = vmatpush3.bf16.msra.mxu1 %v1860_v5  ;;  %1684 = vmatprep.subr.bf16.mxu0 %v1861_v6  ;;  %v2040_v29 = vld [vmem:[%s1973_s29 + $0x61] sm:$0xff]  ;;  %v2043_v30 = vld [vmem:[%s1973_s29 + $0x71] sm:$0xff]  ;;  %v2048_v31 = vpack.c.bf16 %v2027_v25, %v170_v24  ;;  %v552_v51 = vpack.c.bf16 %v170_v24, %v2002_v17  ;;  %v682_v5 = vpack.c.bf16 %v2016_v21, %v1995_v15 }
  0x18   : > { %1700 = vmatprep.subr.bf16.mxu1 %v1862_v10  ;;  %v172_v32 = vld [vmem:[%s1973_s29 + $0x60] sm:$0xff]  ;;  %v2054_v33 = vld [vmem:[%s1973_s29 + $0x70] sm:$0xff]  ;;  %v2068_v36 = vpack.c.bf16 %v2043_v30, %v2040_v29  ;;  %v1876_v60 = vld [vmem:[%s2275_s1 + $0xa8] sm:$0xff]   ;;  %v683_v9 = vpack.c.bf16 %v2040_v29, %v2023_v23 }
  0x19   : > { %v410_v37 = vld [vmem:[%s1973_s29 + $0x2] sm:$0xff]  ;;  %v2072_v38 = vld [vmem:[%s1973_s29 + $0x12] sm:$0xff]  ;;  %v2075_v39 = vpack.c.bf16 %v2054_v33, %v172_v32  ;;  %v553_v55 = vpack.c.bf16 %v172_v32, %v2027_v25 }
  0x1a   : > { %1685 = vmatpush3.bf16.msra.mxu0 %v1861_v6  ;;  %v1870_v41 = vld [vmem:[%s2275_s1 + $0x60] sm:$0xff]   ;;  %v418_v42 = vpack.c.bf16 %v2072_v38, %v410_v37  ;;  %v2092_v45 = vld [vmem:[%s1973_s29 + $0x32] sm:$0xff]  ;;  %v1883_v13 = vld [vmem:[%s2275_s1 + $0xc8] sm:$0xff]  }
  0x1b   : > { %1701 = vmatpush3.bf16.msra.mxu1 %v1862_v10  ;;  %1710 = vmatprep.subr.bf16.mxu0 %v1863_v18  ;;  %v412_v44 = vld [vmem:[%s1973_s29 + $0x22] sm:$0xff]  ;;  %v2107_v50 = vld [vmem:[%s1973_s29 + $0x52] sm:$0xff] }
  0x1c   : > { %1726 = vmatprep.subr.bf16.mxu1 %v1864_v19  ;;  %v414_v48 = vld [vmem:[%s1973_s29 + $0x42] sm:$0xff]  ;;  %v2104_v49 = vpack.c.bf16 %v2092_v45, %v412_v44  ;;  %v1873_v52 = vld [vmem:[%s2275_s1 + $0x90] sm:$0xff]   ;;  %v811_v2 = vpack.c.bf16 %v412_v44, %v2072_v38  ;;  %v1879_v3 = vld [vmem:[%s2275_s1 + $0xd8] sm:$0xff]  }
  0x1d   : > { %1687 = vmatmul.mubr.msk.bf16.vlgmr.msra.gmra.mxu0 %vm231_vm0, %v2013_v20  ;;  %v1874_v53 = vld [vmem:[%s2275_s1 + $0xb0] sm:$0xff]   ;;  %v2117_v54 = vpack.c.bf16 %v2107_v50, %v414_v48  ;;  %v416_v56 = vld [vmem:[%s1973_s29 + $0x62] sm:$0xff]  ;;  %v1880_v4 = vld [vmem:[%s2275_s1 + $0xf8] sm:$0xff]   ;;  %v812_v6 = vpack.c.bf16 %v414_v48, %v2092_v45 }
  0x1e   : > { %1703 = vmatmul.mubr.msk.bf16.vlgmr.msra.gmra.mxu1 %vm231_vm0, %v2020_v22  ;;  %1711 = vmatpush3.bf16.msra.mxu0 %v1863_v18  ;;  %v417_v57 = vld [vmem:[%s1973_s29 + $0x72] sm:$0xff]  ;;  %v2126_v58 = vld [vmem:[%s1973_s29 + $0x80] sm:$0xff]  ;;  %v813_v10 = vpack.c.bf16 %v416_v56, %v2107_v50  ;;  %v1884_v14 = vld [vmem:[%s2275_s1 + $0xe8] sm:$0xff]  }
  0x1f   : > { %1727 = vmatpush3.bf16.msra.mxu1 %v1864_v19  ;;  %1712 = vmatprep.subr.bf16.mxu0 %v1865_v26  ;;  %v2137_v61 = vpack.c.bf16 %v417_v57, %v416_v56  ;;  %v554_v62 = vpack.c.bf16 %v2126_v58, %v2054_v33  ;;  %v1877_v63 = vld [vmem:[%s2275_s1 + $0x80] sm:$0xff]   ;;  %v1881_v7 = vld [vmem:[%s2275_s1 + $0xd0] sm:$0xff]   ;;  %v1887_v19 = vld [vmem:[%s2275_s1 + $0x118] sm:$0xff]  }
  0x20   : > { %1728 = vmatprep.subr.bf16.mxu1 %v1866_v27  ;;  %1690 = vmatprep.mubr.msk.bf16.mxu0 %vm231_vm0, %v2037_v28  ;;  %v1878_v0 = vld [vmem:[%s2275_s1 + $0xa0] sm:$0xff]   ;;  %v1882_v8 = vld [vmem:[%s2275_s1 + $0xf0] sm:$0xff]  }
  0x21   : > { %1706 = vmatprep.mubr.msk.bf16.mxu1 %vm231_vm0, %v2048_v31  ;;  %v1491_v11 = vld [vmem:[%s1973_s29 + $0x81] sm:$0xff]  ;;  %v1888_v21 = vld [vmem:[%s2275_s1 + $0x110] sm:$0xff]  }
  0x22   : > { %1713 = vmatpush3.bf16.msra.mxu0 %v1865_v26  ;;  %v1515_v12 = vld [vmem:[%s1973_s29 + $0x82] sm:$0xff]  ;;  %v684_v15 = vpack.c.bf16 %v1491_v11, %v2043_v30  ;;  %v1539_v23 = vld [vmem:[%s1973_s29 + $0x90] sm:$0xff] }
  0x23   : > { %1729 = vmatpush3.bf16.msra.mxu1 %v1866_v27  ;;  %1714 = vmatprep.subr.bf16.mxu0 %v1867_v34  ;;  %v814_v16 = vpack.c.bf16 %v1515_v12, %v417_v57  ;;  %v1885_v17 = vld [vmem:[%s2275_s1 + $0xc0] sm:$0xff]   ;;  %v947_v24 = vpack.c.bf16 %v1539_v23, %v2126_v58  ;;  %v1587_v27 = vld [vmem:[%s1973_s29 + $0x92] sm:$0xff] }
  0x24   : > { %1730 = vmatprep.subr.bf16.mxu1 %v1868_v35  ;;  %v1886_v18 = vld [vmem:[%s2275_s1 + $0xe0] sm:$0xff]  }
  0x25   : > { %1691 = vmatmul.mubr.msk.bf16.gmra.mxu0 %vm231_vm0, %v2068_v36  ;;  %v1890_v26 = vld [vmem:[%s2275_s1 + $0x100] sm:$0xff]  }
  0x26   : > { %1707 = vmatmul.mubr.msk.bf16.gmra.mxu1 %vm231_vm0, %v2075_v39  ;;  %1715 = vmatpush3.bf16.msra.mxu0 %v1867_v34 }
  0x27   : > { %1731 = vmatpush3.bf16.msra.mxu1 %v1868_v35  ;;  %1716 = vmatprep.subr.bf16.mxu0 %v1869_v40 }
  0x28   : > { %1732 = vmatprep.subr.bf16.mxu1 %v1870_v41  ;;  %1718 = vmatprep.mubr.msk.bf16.mxu0 %vm231_vm0, %v418_v42 }
  0x29   : > { %1734 = vmatprep.mubr.msk.bf16.mxu1 %vm231_vm0, %v551_v43 }
  0x2a   : > { %1717 = vmatpush3.bf16.msra.mxu0 %v1869_v40 }
  0x2b   : > { %1733 = vmatpush3.bf16.msra.mxu1 %v1870_v41  ;;  %1742 = vmatprep.subr.bf16.mxu0 %v1871_v46 }
  0x2c   : > { %1758 = vmatprep.subr.bf16.mxu1 %v1872_v47 }
  0x2d   : > { %1719 = vmatmul.mubr.msk.bf16.vlgmr.msra.gmra.mxu0 %vm231_vm0, %v2104_v49 }
  0x2e   : > { %1735 = vmatmul.mubr.msk.bf16.vlgmr.msra.gmra.mxu1 %vm231_vm0, %v552_v51  ;;  %1743 = vmatpush3.bf16.msra.mxu0 %v1871_v46 }
  0x2f   : > { %1759 = vmatpush3.bf16.msra.mxu1 %v1872_v47  ;;  %1744 = vmatprep.subr.bf16.mxu0 %v1873_v52 }
  0x30   : > { %1760 = vmatprep.subr.bf16.mxu1 %v1874_v53  ;;  %1722 = vmatprep.mubr.msk.bf16.mxu0 %vm231_vm0, %v2117_v54 }
  0x31   : > { %1738 = vmatprep.mubr.msk.bf16.mxu1 %vm231_vm0, %v553_v55 }
  0x32   : > { %1745 = vmatpush3.bf16.msra.mxu0 %v1873_v52 }
  0x33   : > { %1761 = vmatpush3.bf16.msra.mxu1 %v1874_v53  ;;  %1746 = vmatprep.subr.bf16.mxu0 %v1875_v59 }
  0x34   : > { %1762 = vmatprep.subr.bf16.mxu1 %v1876_v60 }
  0x35   : > { %1723 = vmatmul.mubr.msk.bf16.gmra.mxu0 %vm231_vm0, %v2137_v61 }
  0x36   : > { %1739 = vmatmul.mubr.msk.bf16.gmra.mxu1 %vm231_vm0, %v554_v62  ;;  %1747 = vmatpush3.bf16.msra.mxu0 %v1875_v59 }
  0x37   : > { %1763 = vmatpush3.bf16.msra.mxu1 %v1876_v60  ;;  %1748 = vmatprep.subr.bf16.mxu0 %v1877_v63 }
  0x38   : > { %1764 = vmatprep.subr.bf16.mxu1 %v1878_v0  ;;  %1750 = vmatprep.mubr.msk.bf16.mxu0 %vm231_vm0, %v681_v1 }
  0x39   : > { %1766 = vmatprep.mubr.msk.bf16.mxu1 %vm231_vm0, %v811_v2 }
  0x3a   : > { %1749 = vmatpush3.bf16.msra.mxu0 %v1877_v63 }
  0x3b   : > { %1765 = vmatpush3.bf16.msra.mxu1 %v1878_v0  ;;  %1774 = vmatprep.subr.bf16.mxu0 %v1879_v3 }
  0x3c   : > { %1790 = vmatprep.subr.bf16.mxu1 %v1880_v4 }
  0x3d   : > { %1751 = vmatmul.mubr.msk.bf16.vlgmr.msra.gmra.mxu0 %vm231_vm0, %v682_v5 }
  0x3e   : > { %1767 = vmatmul.mubr.msk.bf16.vlgmr.msra.gmra.mxu1 %vm231_vm0, %v812_v6  ;;  %1775 = vmatpush3.bf16.msra.mxu0 %v1879_v3 }
  0x3f   : > { %1791 = vmatpush3.bf16.msra.mxu1 %v1880_v4  ;;  %1776 = vmatprep.subr.bf16.mxu0 %v1881_v7 }
  0x40   : > { %1792 = vmatprep.subr.bf16.mxu1 %v1882_v8  ;;  %1754 = vmatprep.mubr.msk.bf16.mxu0 %vm231_vm0, %v683_v9 }
  0x41   : > { %1770 = vmatprep.mubr.msk.bf16.mxu1 %vm231_vm0, %v813_v10 }
  0x42   : > { %1777 = vmatpush3.bf16.msra.mxu0 %v1881_v7 }
  0x43   : > { %1793 = vmatpush3.bf16.msra.mxu1 %v1882_v8  ;;  %1778 = vmatprep.subr.bf16.mxu0 %v1883_v13 }
  0x44   : > { %1794 = vmatprep.subr.bf16.mxu1 %v1884_v14 }
  0x45   : > { %1755 = vmatmul.mubr.msk.bf16.gmra.mxu0 %vm231_vm0, %v684_v15 }
  0x46   : > { %1771 = vmatmul.mubr.msk.bf16.gmra.mxu1 %vm231_vm0, %v814_v16  ;;  %1779 = vmatpush3.bf16.msra.mxu0 %v1883_v13 }
  0x47   : > { %1795 = vmatpush3.bf16.msra.mxu1 %v1884_v14  ;;  %1780 = vmatprep.subr.bf16.mxu0 %v1885_v17 }
  0x48   : > { %1796 = vmatprep.subr.bf16.mxu1 %v1886_v18  ;;  %1782 = vmatprep.mubr.msk.bf16.mxu0 %vm231_vm0, %v2020_v22  ;;  %v1563_v22 = vld [vmem:[%s1973_s29 + $0x91] sm:$0xff]  ;;  %s1418_s29 = sshll.u32 %s1905_s9, 3 }
  0x49   : > { %1798 = vmatprep.mubr.msk.bf16.mxu1 %vm231_vm0, %v2013_v20  ;;  %v1889_v20 = vld [vmem:[%s2275_s1 + $0x108] sm:$0xff]   ;;  %v1077_v25 = vpack.c.bf16 %v1563_v22, %v1491_v11  ;;  %p2236_p5 = scmp.lt.s32.totalorder %s1418_s29, 15 }
  0x4a   : > { %1781 = vmatpush3.bf16.msra.mxu0 %v1885_v17 }
  0x4b   : > { %1797 = vmatpush3.bf16.msra.mxu1 %v1886_v18  ;;  %1806 = vmatprep.subr.bf16.mxu0 %v1887_v19  ;;  %s2283_s29 = smov (!%p2236_p5, %s1418_s29), 15 }
  0x4c   : > { %1822 = vmatprep.subr.bf16.mxu1 %v1887_v19  ;;  %s1419_s9 = sshll.u32 %s2283_s29, 3 }
  0x4d   : > { %1783 = vmatmul.mubr.msk.bf16.vlgmr.msra.gmra.mxu0 %vm231_vm0, %v2048_v31  ;;  %s2247_s23 = scalar_lea.vmem %s2276_s2, %s1419_s9 }
  0x4e   : > { %1799 = vmatmul.mubr.msk.bf16.vlgmr.msra.gmra.mxu1 %vm231_vm0, %v2037_v28  ;;  %1807 = vmatpush3.bf16.msra.mxu0 %v1887_v19  ;;  %v1207_v28 = vpack.c.bf16 %v1587_v27, %v1515_v12 }
  0x4f   : > { %1826 = vmatpush3.bf16.msra.mxu1 %v1887_v19  ;;  %1808 = vmatprep.subr.bf16.mxu0 %v1888_v21 }
  0x50   : > { %1823 = vmatprep.subr.bf16.mxu1 %v1888_v21  ;;  %1786 = vmatprep.mubr.msk.bf16.mxu0 %vm231_vm0, %v2075_v39 }
  0x51   : > { %1802 = vmatprep.mubr.msk.bf16.mxu1 %vm231_vm0, %v2068_v36 }
  0x52   : > { %1809 = vmatpush3.bf16.msra.mxu0 %v1888_v21 }
  0x53   : > { %1827 = vmatpush3.bf16.msra.mxu1 %v1888_v21  ;;  %1810 = vmatprep.subr.bf16.mxu0 %v1889_v20 }
  0x54   : > { %1824 = vmatprep.subr.bf16.mxu1 %v1889_v20 }
  0x55   : > { %1787 = vmatmul.mubr.msk.bf16.gmra.mxu0 %vm231_vm0, %v947_v24 }
  0x56   : > { %1803 = vmatmul.mubr.msk.bf16.gmra.mxu1 %vm231_vm0, %v1077_v25  ;;  %1811 = vmatpush3.bf16.msra.mxu0 %v1889_v20 }
  0x57   : > { %1828 = vmatpush3.bf16.msra.mxu1 %v1889_v20  ;;  %1812 = vmatprep.subr.bf16.mxu0 %v1890_v26 }
  0x58   : > { %1825 = vmatprep.subr.bf16.mxu1 %v1890_v26  ;;  %1814 = vmatprep.mubr.msk.bf16.mxu0 %vm231_vm0, %v2104_v49 }
  0x59   : > { %1818 = vmatprep.mubr.msk.bf16.mxu1 %vm231_vm0, %v2137_v61 }
  0x5a   : > { %1813 = vmatpush3.bf16.msra.mxu0 %v1890_v26 }
  0x5b   : > { %1829 = vmatpush3.bf16.msra.mxu1 %v1890_v26 }
  0x5d   : > { %1815 = vmatmul.mubr.msk.bf16.vlgmr.msra.gmra.mxu0 %vm231_vm0, %v2117_v54 }
  0x5e   : > { %1819 = vmatmul.mubr.msk.bf16.vlgmr.msra.gmra.mxu1 %vm231_vm0, %v1207_v28 }
  0xdd   : > { %v1688_v29 = vpop.f32.mrf.mxu0 }
  0xde   : > { %v1704_v30 = vpop.f32.mrf.mxu1 }
  0xdf   : > { %v278_v31 = vpop.f32.mrf.mxu0  ;;  %v388_v10 = vadd.f32 %v1704_v30, %v1688_v29 }
  0xe0   : > { %v379_v32 = vpop.f32.mrf.mxu1 }
  0xe1   : > { %v1689_v33 = vpop.f32.mrf.mxu0  ;;  %v380_v14 = vadd.f32 %v379_v32, %v278_v31 }
  0xe2   : > { %v1705_v34 = vpop.f32.mrf.mxu1 }
  0xe3   : > { %v281_v35 = vpop.f32.mrf.mxu0  ;;  %v391_v21 = vadd.f32 %v1705_v34, %v1689_v33 }
  0xe4   : > { %v382_v36 = vpop.f32.mrf.mxu1 }
  0xe5   : > { %v1692_v37 = vpop.f32.mrf.mxu0  ;;  %v383_v26 = vadd.f32 %v382_v36, %v281_v35 }
  0xe6   : > { %v1708_v38 = vpop.f32.mrf.mxu1 }
  0xe7   : > { %v294_v39 = vpop.f32.mrf.mxu0  ;;  %v404_v12 = vadd.f32 %v1708_v38, %v1692_v37 }
  0xe8   : > { %v395_v40 = vpop.f32.mrf.mxu1 }
  0xe9   : > { %v1693_v41 = vpop.f32.mrf.mxu0  ;;  %v396_v17 = vadd.f32 %v395_v40, %v294_v39 }
  0xea   : > { %v1709_v42 = vpop.f32.mrf.mxu1 }
  0xeb   : > { %v297_v43 = vpop.f32.mrf.mxu0  ;;  %v407_v20 = vadd.f32 %v1709_v42, %v1693_v41 }
  0xec   : > { %v398_v44 = vpop.f32.mrf.mxu1 }
  0xed   : > { %v1720_v45 = vpop.f32.mrf.mxu0  ;;  %v399_v30 = vadd.f32 %v398_v44, %v297_v43 }
  0xee   : > { %v1736_v46 = vpop.f32.mrf.mxu1  ;;  %v534_v15 = vadd.f32 %v1720_v45, %v388_v10 }
  0xef   : > { %v501_v47 = vpop.f32.mrf.mxu0 }
  0xf0   : > { %v634_v48 = vpop.f32.mrf.mxu1  ;;  %v532_v23 = vadd.f32 %v501_v47, %v380_v14  ;;  %v667_v27 = vadd.f32 %v1736_v46, %v534_v15 }
  0xf1   : > { %v1721_v49 = vpop.f32.mrf.mxu0 }
  0xf2   : > { %v1737_v50 = vpop.f32.mrf.mxu1  ;;  %v535_v28 = vadd.f32 %v1721_v49, %v391_v21  ;;  %v665_v32 = vadd.f32 %v634_v48, %v532_v23 }
  0xf3   : > { %v504_v51 = vpop.f32.mrf.mxu0 }
  0xf4   : > { %v637_v52 = vpop.f32.mrf.mxu1  ;;  %v533_v45 = vadd.f32 %v504_v51, %v383_v26  ;;  %v668_v36 = vadd.f32 %v1737_v50, %v535_v28 }
  0xf5   : > { %v1724_v53 = vpop.f32.mrf.mxu0 }
  0xf6   : > { %v1740_v54 = vpop.f32.mrf.mxu1  ;;  %v538_v18 = vadd.f32 %v1724_v53, %v404_v12  ;;  %v666_v49 = vadd.f32 %v637_v52, %v533_v45 }
  0xf7   : > { %v517_v55 = vpop.f32.mrf.mxu0 }
  0xf8   : > { %v650_v56 = vpop.f32.mrf.mxu1  ;;  %v536_v24 = vadd.f32 %v517_v55, %v396_v17  ;;  %v671_v37 = vadd.f32 %v1740_v54, %v538_v18 }
  0xf9   : > { %v1725_v57 = vpop.f32.mrf.mxu0 }
  0xfa   : > { %v1741_v58 = vpop.f32.mrf.mxu1  ;;  %v539_v38 = vadd.f32 %v1725_v57, %v407_v20  ;;  %v669_v33 = vadd.f32 %v650_v56, %v536_v24 }
  0xfb   : > { %v520_v59 = vpop.f32.mrf.mxu0 }
  0xfc   : > { %v653_v60 = vpop.f32.mrf.mxu1  ;;  %v537_v34 = vadd.f32 %v520_v59, %v399_v30  ;;  %v672_v43 = vadd.f32 %v1741_v58, %v539_v38 }
  0xfd   : > { %v1752_v61 = vpop.f32.mrf.mxu0 }
  0xfe   : > { %v1768_v62 = vpop.f32.mrf.mxu1  ;;  %v797_v39 = vadd.f32 %v1752_v61, %v667_v27  ;;  %v670_v54 = vadd.f32 %v653_v60, %v537_v34 }
  0xff   : > { %v764_v63 = vpop.f32.mrf.mxu0 }
 0x100   : > { %v894_v0 = vpop.f32.mrf.mxu1  ;;  %v795_v42 = vadd.f32 %v764_v63, %v665_v32  ;;  %v927_v48 = vadd.f32 %v1768_v62, %v797_v39 }
 0x101   : > { %v1753_v1 = vpop.f32.mrf.mxu0 }
 0x102   : > { %v2231_v2 = vpop.f32.mrf.mxu1  ;;  %v798_v51 = vadd.f32 %v1753_v1, %v668_v36  ;;  %v925_v56 = vadd.f32 %v894_v0, %v795_v42 }
 0x103   : > { %v767_v3 = vpop.f32.mrf.mxu0 }
 0x104   : > { %v2233_v4 = vpop.f32.mrf.mxu1  ;;  %v796_v59 = vadd.f32 %v767_v3, %v666_v49 }
 0x105   : > { %v1756_v5 = vpop.f32.mrf.mxu0 }
 0x106   : > { %v1772_v6 = vpop.f32.mrf.mxu1  ;;  %v801_v41 = vadd.f32 %v1756_v5, %v671_v37  ;;  %v926_v60 = vadd.f32 %v2233_v4, %v796_v59 }
 0x107   : > { %v780_v7 = vpop.f32.mrf.mxu0 }
 0x108   : > { %v910_v8 = vpop.f32.mrf.mxu1  ;;  %v799_v44 = vadd.f32 %v780_v7, %v669_v33  ;;  %v931_v55 = vadd.f32 %v1772_v6, %v801_v41  ;;  %v928_v7 = vadd.f32 %v2231_v2, %v798_v51 }
 0x109   : > { %v1757_v9 = vpop.f32.mrf.mxu0 }
 0x10a   : > { %v1773_v11 = vpop.f32.mrf.mxu1  ;;  %v802_v57 = vadd.f32 %v1757_v9, %v672_v43  ;;  %v929_v50 = vadd.f32 %v910_v8, %v799_v44 }
 0x10b   : > { %v783_v13 = vpop.f32.mrf.mxu0 }
 0x10c   : > { %v913_v16 = vpop.f32.mrf.mxu1  ;;  %v800_v63 = vadd.f32 %v783_v13, %v670_v54  ;;  %v932_v1 = vadd.f32 %v1773_v11, %v802_v57 }
 0x10d   : > { %v1784_v19 = vpop.f32.mrf.mxu0 }
 0x10e   : > { %v1800_v22 = vpop.f32.mrf.mxu1  ;;  %v1060_v5 = vadd.f32 %v1784_v19, %v927_v48  ;;  %v930_v3 = vadd.f32 %v913_v16, %v800_v63 }
 0x10f   : > { %v1027_v25 = vpop.f32.mrf.mxu0 }
 0x110   : > { %v1157_v29 = vpop.f32.mrf.mxu1  ;;  %v1058_v52 = vadd.f32 %v1027_v25, %v925_v56  ;;  %v1190_v6 = vadd.f32 %v1800_v22, %v1060_v5 }
 0x111   : > { %v1785_v31 = vpop.f32.mrf.mxu0 }
 0x112   : > { %v1801_v40 = vpop.f32.mrf.mxu1  ;;  %v1061_v9 = vadd.f32 %v1785_v31, %v928_v7  ;;  %v1188_v8 = vadd.f32 %v1157_v29, %v1058_v52 }
 0x113   : > { %v1030_v35 = vpop.f32.mrf.mxu0 }
 0x114   : > { %v1160_v46 = vpop.f32.mrf.mxu1  ;;  %v1059_v11 = vadd.f32 %v1030_v35, %v926_v60  ;;  %v1191_v22 = vadd.f32 %v1801_v40, %v1061_v9 }
 0x115   : > { %v1788_v47 = vpop.f32.mrf.mxu0 }
 0x116   : > { %v1804_v53 = vpop.f32.mrf.mxu1  ;;  %v1064_v12 = vadd.f32 %v1788_v47, %v931_v55  ;;  %v1189_v28 = vadd.f32 %v1160_v46, %v1059_v11 }
 0x117   : > { %v1043_v61 = vpop.f32.mrf.mxu0 }
 0x118   : > { %v1173_v10 = vpop.f32.mrf.mxu1  ;;  %v1062_v14 = vadd.f32 %v1043_v61, %v929_v50  ;;  %v1194_v17 = vadd.f32 %v1804_v53, %v1064_v12 }
 0x119   : > { %v1789_v58 = vpop.f32.mrf.mxu0 }
 0x11a   : > { %v1805_v62 = vpop.f32.mrf.mxu1  ;;  %v1065_v18 = vadd.f32 %v1789_v58, %v932_v1  ;;  %v1192_v4 = vadd.f32 %v1173_v10, %v1062_v14 }
 0x11b   : > { %v1046_v15 = vpop.f32.mrf.mxu0 }
 0x11c   : > { %v1176_v0 = vpop.f32.mrf.mxu1  ;;  %v1063_v21 = vadd.f32 %v1046_v15, %v930_v3  ;;  %v1195_v25 = vadd.f32 %v1805_v62, %v1065_v18 }
 0x11d   : > { %v1816_v2 = vpop.f32.mrf.mxu0 }
 0x11e   : > { %v1320_v13 = vadd.f32 %v1816_v2, %v1190_v6  ;;  %v1820_v19 = vpop.f32.mrf.mxu1  ;;  %v1193_v37 = vadd.f32 %v1176_v0, %v1063_v21 }
 0x11f   : > { %v1324_v23 = vadd.f32 %v1820_v19, %v1194_v17  ;;  %v1287_v16 = vpop.f32.mrf.mxu0 }
 0x120   : > { %1328 = vst.msk [vmem:[%s2247_s23 + $0x10] sm:$0xff] %vm231_vm0, %v1320_v13  ;;  %v1318_v20 = vadd.f32 %v1287_v16, %v1188_v8  ;;  %v1303_v24 = vpop.f32.mrf.mxu1 }
 0x121   : > { %1332 = vst.msk [vmem:[%s2247_s23 + $0x30] sm:$0xff] %vm231_vm0, %v1324_v23  ;;  %v1322_v26 = vadd.f32 %v1303_v24, %v1192_v4  ;;  %v1817_v27 = vpop.f32.mrf.mxu0 }
 0x122   : > { %1326 = vst.msk [vmem:[%s2247_s23] sm:$0xff] %vm231_vm0, %v1318_v20  ;;  %v1321_v29 = vadd.f32 %v1817_v27, %v1191_v22  ;;  %v1821_v30 = vpop.f32.mrf.mxu1 }
 0x123   : > { %1330 = vst.msk [vmem:[%s2247_s23 + $0x20] sm:$0xff] %vm231_vm0, %v1322_v26  ;;  %v1325_v38 = vadd.f32 %v1821_v30, %v1195_v25  ;;  %v1290_v31 = vpop.f32.mrf.mxu0 }
 0x124   : > { %1329 = vst.msk [vmem:[%s2247_s23 + $0x18] sm:$0xff] %vm231_vm0, %v1321_v29  ;;  %v1319_v32 = vadd.f32 %v1290_v31, %v1189_v28  ;;  %v1306_v45 = vpop.f32.mrf.mxu1 }
 0x125   : > { %1333 = vst.msk [vmem:[%s2247_s23 + $0x38] sm:$0xff] %vm231_vm0, %v1325_v38  ;;  %v1323_v39 = vadd.f32 %v1306_v45, %v1193_v37 }
 0x126   : > { %1327 = vst.msk [vmem:[%s2247_s23 + $0x8] sm:$0xff] %vm231_vm0, %v1319_v32 }
 0x127   : > { %1331 = vst.msk [vmem:[%s2247_s23 + $0x28] sm:$0xff] %vm231_vm0, %v1323_v39 }
 0x128 PF: > { %s12_s11 = sadd.s32 1, %s1913_s11   ;;  %s2278_s9 = smov %s1909_s10 }
 0x129   : > { %p9_p6 = scmp.ge.s32.totalorder %s12_s11, 4   ;;  %s2279_s10 = smov %s2281_s12 }
 0x12b   :  { %11 = sbr.rel (!%p9_p6) target bundleno = 2 (0x2), region = 69 }

</bundles_post_ra>
